<compile_context>
chip_gen: v7x
topology: tpu7x:2x2x1
jax: 0.10.0
libtpu: 0.0.40
codegen_flags: <defaults>
</compile_context>

<pallas_src>
import functools

import jax
import jax.numpy as jnp
import numpy as np
from jax import lax
from jax.experimental import pallas as pl
from jax.experimental.pallas import tpu as pltpu


# --------------------------------------------------------------------------- #
# Fused forward kernel (gridless, everything VMEM-resident)
# --------------------------------------------------------------------------- #
def _lenet_fused_kernel(xrow_ref, w1_ref, b1_ref, w2_ref, b2_ref, w3_ref, b3_ref,
                        w4_ref, b4_ref, w5_ref, b5_ref, out_ref, a1_ref, a2_ref,
                        *, n_batch):
    f32 = jnp.float32

    # ---- stage 1: conv1(3->6, 3x3) + 2x2 maxpool + ReLU ---------------------- #
    # xrow_ref[di] : [N*16, 384] row (n, ho%2, ho//2) holds the 3 image rows feeding
    #                pooled row ho at pool row-offset di, lanes (ki, j, ci).
    # w1_ref[dj]   : [384, 128] Toeplitz-folded conv1 weight for pool col-offset dj,
    #                output lanes (wo, co) = wo*6 + co (90 valid, rest zero).
    taps = []
    for di in range(2):
        xr = xrow_ref[di]
        for dj in range(2):
            taps.append(jnp.dot(xr, w1_ref[dj], preferred_element_type=f32))
    m1 = jnp.maximum(jnp.maximum(taps[0], taps[1]), jnp.maximum(taps[2], taps[3]))
    a1_ref[...] = jnp.maximum(m1 + b1_ref[...], 0.0)      # [N*16, 128], pad lanes == 0

    # ---- stage 2 (conv2+pool+ReLU) + fused FC chain, per sample (unrolled) --- #
    hs = []
    for n in range(n_batch):
        base = n * 16
        t2 = []
        for di2 in range(2):
            # rows ho = 2*ho2 + di2 + ki are one contiguous 6-row slice per ki
            parts = []
            for ki in range(3):
                pi = di2 + ki
                r0 = base + (pi % 2) * 8 + pi // 2
                parts.append(a1_ref[r0:r0 + 6, :])
            lhs = jnp.concatenate(parts, axis=1)           # [6, 384]
            for dj2 in range(2):
                t2.append(jnp.dot(lhs, w2_ref[dj2], preferred_element_type=f32))
        m2 = jnp.maximum(jnp.maximum(t2[0], t2[1]), jnp.maximum(t2[2], t2[3]))
        a2_ref[...] = jnp.maximum(m2 + b2_ref[...], 0.0)   # [6, 128], lanes (wo2, c2)

        # fc3: contract over (ho2 rows, 96 valid lanes); torch's NCHW flatten is folded
        # into w3_ref, so the "reshape" costs nothing.
        h = jnp.dot(a2_ref[0:1, :], w3_ref[0], preferred_element_type=f32)
        for ho2 in range(1, 6):
            h = h + jnp.dot(a2_ref[ho2:ho2 + 1, :], w3_ref[ho2],
                            preferred_element_type=f32)
        hs.append(h)                                        # [1, 128]

    h = jnp.concatenate(hs, axis=0)                         # [N, 128]
    h = jnp.maximum(h + b3_ref[...], 0.0)                   # fc3 bias + ReLU
    h = jnp.maximum(jnp.dot(h, w4_ref[...], preferred_element_type=f32)
                    + b4_ref[...], 0.0)                     # fc4 + ReLU
    out_ref[...] = (jnp.dot(h, w5_ref[...], preferred_element_type=f32)
                    + b5_ref[...])                          # fc5 logits (10 valid lanes)


def forward(prep, x_nchw):
    n = x_nchw.shape[0]
    xrow = _stage1_rows(x_nchw)                             # only remaining XLA glue
    vmem = pl.BlockSpec(memory_space=pltpu.MemorySpace.VMEM)
    out = pl.pallas_call(
        functools.partial(_lenet_fused_kernel, n_batch=n),
        out_shape=jax.ShapeDtypeStruct((n, 128), jnp.float32),
        in_specs=[vmem] * 11,
        out_specs=vmem,
        scratch_shapes=[pltpu.VMEM((n * 16, 128), jnp.float32),   # a1 (pooled stage-1)
                        pltpu.VMEM((6, 128), jnp.float32)],       # a2 (per-sample)
    )(xrow, prep["w1big"], prep["b1row"], prep["w2cat"], prep["b2row"],
      prep["w3r"], prep["b3row"], prep["w4p"], prep["b4row"],
      prep["w5p"], prep["b5row"])
    return out[:, :10]


# --------------------------------------------------------------------------- #
# Input-side glue: rearrange x into the stage-1 matmul row layout
# --------------------------------------------------------------------------- #
def _stage1_rows(x_nchw):
    """[N,3,32,32] -> [2, N*16, 384] f32.

    Row (n, ho%2, ho//2) of slab di holds image rows 2*ho+di+ki (ki=0..2) of sample n,
    at lanes ki*96 + j*3 + ci, so conv1 + pool tap (di, dj) is one matmul against the
    Toeplitz-folded weight w1big[dj].  Parity-grouping the pooled rows is what makes
    every stage-2 tap a contiguous static slice inside the kernel.  Pad row
    (parity 1, half 7) and lanes 288..383 are zero and never consumed downstream."""
    n = x_nchw.shape[0]
    x = jnp.transpose(x_nchw, (0, 2, 3, 1)).reshape(n, 32, 96)   # lanes j*3 + ci
    slabs = []
    for di in range(2):
        per_ki = []
        for ki in range(3):
            rows = x[:, di + ki:di + ki + 29:2, :]               # image row 2*ho + di + ki
            rows = jnp.pad(rows, ((0, 0), (0, 1), (0, 0)))       # ho: 15 -> 16
            per_ki.append(rows.reshape(n, 8, 2, 96).transpose(0, 2, 1, 3))
        s = jnp.stack(per_ki, axis=3).reshape(n, 2, 8, 288)      # (n, ho%2, ho//2, lanes)
        s = jnp.pad(s, ((0, 0), (0, 0), (0, 0), (0, 96)))        # K: 288 -> 384
        slabs.append(s.reshape(n * 16, 384))
    return jnp.stack(slabs, axis=0)


# --------------------------------------------------------------------------- #
# Parameters: PyTorch-layout init + one-time host-side fold into kernel layouts
# --------------------------------------------------------------------------- #
def init_params(key):
    """Deterministic PyTorch-style (uniform +/- 1/sqrt(fan_in)) initialization."""
    ks = jax.random.split(key, 10)

    def u(k, shape, fan_in):
        bound = 1.0 / (fan_in ** 0.5)
        return jax.random.uniform(k, shape, jnp.float32, -bound, bound)

    return {
        "w1": u(ks[0], (6, 3, 3, 3), 3 * 3 * 3),
        "b1": u(ks[1], (6,), 3 * 3 * 3),
        "w2": u(ks[2], (16, 6, 3, 3), 6 * 3 * 3),
        "b2": u(ks[3], (16,), 6 * 3 * 3),
        "w3": u(ks[4], (120, 576), 576),
        "b3": u(ks[5], (120,), 576),
        "w4": u(ks[6], (84, 120), 120),
        "b4": u(ks[7], (84,), 120),
        "w5": u(ks[8], (10, 84), 84),
        "b5": u(ks[9], (10,), 84),
    }


def prepare_params(raw):
    """Fold conv weights into lane-dense Toeplitz matmul weights, fold the torch NCHW
    flatten into fc3, and zero-pad every K/N dim to 128-lane multiples (host, once)."""
    w1 = np.asarray(raw["w1"]); b1 = np.asarray(raw["b1"])
    w2 = np.asarray(raw["w2"]); b2 = np.asarray(raw["b2"])
    w3 = np.asarray(raw["w3"]); b3 = np.asarray(raw["b3"])
    w4 = np.asarray(raw["w4"]); b4 = np.asarray(raw["b4"])
    w5 = np.asarray(raw["w5"]); b5 = np.asarray(raw["b5"])

    # conv1: rows (ki, j, ci) = ki*96 + j*3 + ci (288->384), cols (wo, co) = wo*6 + co
    w1big = np.zeros((2, 384, 128), np.float32)
    for dj in range(2):
        for ki in range(3):
            for wo in range(15):
                for kj in range(3):
                    j = 2 * wo + dj + kj
                    r = ki * 96 + j * 3
                    w1big[dj, r:r + 3, wo * 6:wo * 6 + 6] = w1[:, :, ki, kj].T
    b1row = np.zeros((1, 128), np.float32)
    for wo in range(15):
        b1row[0, wo * 6:wo * 6 + 6] = b1

    # conv2: rows (ki, wo1, c1) = ki*128 + wo1*6 + c1 (3 lane-concat blocks of 90->128),
    #        cols (wo2, c2) = wo2*16 + c2 (96 -> 128)
    w2cat = np.zeros((2, 384, 128), np.float32)
    for dj2 in range(2):
        for ki in range(3):
            for wo2 in range(6):
                for kj in range(3):
                    wo1 = 2 * wo2 + dj2 + kj
                    r = ki * 128 + wo1 * 6
                    w2cat[dj2, r:r + 6, wo2 * 16:wo2 * 16 + 16] = w2[:, :, ki, kj].T
    b2row = np.zeros((1, 128), np.float32)
    for wo2 in range(6):
        b2row[0, wo2 * 16:wo2 * 16 + 16] = b2

    # fc3 (densified, NCHW-flatten folded in): per-pooled-row slab,
    # rows (wo2, c2) = wo2*16 + c2, cols out (120 -> 128); f = c2*36 + ho2*6 + wo2.
    w3r = np.zeros((6, 128, 128), np.float32)
    w3_chw = w3.reshape(120, 16, 6, 6)                        # [out, c2, ho2, wo2]
    w3r[:, :96, :120] = np.transpose(w3_chw, (2, 3, 1, 0)).reshape(6, 96, 120)
    b3row = np.zeros((1, 128), np.float32); b3row[0, :120] = b3

    w4p = np.zeros((128, 128), np.float32); w4p[:120, :84] = w4.T
    b4row = np.zeros((1, 128), np.float32); b4row[0, :84] = b4
    w5p = np.zeros((128, 128), np.float32); w5p[:84, :10] = w5.T
    b5row = np.zeros((1, 128), np.float32); b5row[0, :10] = b5

    return {k: jnp.asarray(v) for k, v in {
        "w1big": w1big, "b1row": b1row, "w2cat": w2cat, "b2row": b2row,
        "w3r": w3r, "b3row": b3row, "w4p": w4p, "b4row": b4row,
        "w5p": w5p, "b5row": b5row}.items()}


# --------------------------------------------------------------------------- #
# Pure-JAX reference (independent of the Pallas path) for correctness checking
# --------------------------------------------------------------------------- #
def _ref_forward(raw, x_nchw):
    x = jnp.transpose(x_nchw, (0, 2, 3, 1))

    def conv(y, w, b):
        dn = lax.conv_dimension_numbers(y.shape, w.shape, ("NHWC", "OIHW", "NHWC"))
        y = lax.conv_general_dilated(y, w, (1, 1), "VALID", dimension_numbers=dn,
                                     precision=lax.Precision.HIGHEST)
        return y + b.reshape(1, 1, 1, -1)

    def pool(y):
        n, h, w, c = y.shape
        ho, wo = h // 2, w // 2
        y = y[:, :2 * ho, :2 * wo, :].reshape(n, ho, 2, wo, 2, c)
        return y.max(axis=(2, 4))

    y = pool(jnp.maximum(conv(x, raw["w1"], raw["b1"]), 0.0))
    y = pool(jnp.maximum(conv(y, raw["w2"], raw["b2"]), 0.0))
    y = jnp.transpose(y, (0, 3, 1, 2)).reshape(x_nchw.shape[0], -1)
    hi = lax.Precision.HIGHEST
    y = jnp.maximum(jnp.dot(y, raw["w3"].T, precision=hi) + raw["b3"], 0.0)
    y = jnp.maximum(jnp.dot(y, raw["w4"].T, precision=hi) + raw["b4"], 0.0)
    return jnp.dot(y, raw["w5"].T, precision=hi) + raw["b5"]


if __name__ == "__main__":
    key = jax.random.PRNGKey(0)
    pkey, xkey = jax.random.split(key)
    raw = init_params(pkey)
    prep = prepare_params(raw)

    # Module implies 3x32x32 inputs (576 = 16 * 6 * 6 after the two conv/pool stages).
    x = jax.random.normal(xkey, (2, 3, 32, 32), dtype=jnp.float32)

    out = jax.jit(forward)(prep, x)
    out = jax.block_until_ready(out)
    assert out.shape == (2, 10)
    assert bool(jnp.all(jnp.isfinite(out)))

    # Tolerance sized for MXU f32 rounding; any layout/weight-fold bug produces O(0.1+)
    # errors, which this comfortably catches (much tighter than the previous 2e-2).
    ref = _ref_forward(raw, x)
    assert bool(jnp.allclose(out, ref, atol=5e-3, rtol=5e-3)), \
        f"max abs err {float(jnp.max(jnp.abs(out - ref)))}"
    print("KERNEL_OK")
</pallas_src>

<mosaic_0001>
module attributes {stable_mosaic.version = 11 : i64} {
  func.func @_lenet_fused_kernel(%arg0: memref<2x32x384xf32, #tpu.memory_space<vmem>>, %arg1: memref<2x384x128xf32, #tpu.memory_space<vmem>>, %arg2: memref<1x128xf32, #tpu.memory_space<vmem>>, %arg3: memref<2x384x128xf32, #tpu.memory_space<vmem>>, %arg4: memref<1x128xf32, #tpu.memory_space<vmem>>, %arg5: memref<6x128x128xf32, #tpu.memory_space<vmem>>, %arg6: memref<1x128xf32, #tpu.memory_space<vmem>>, %arg7: memref<128x128xf32, #tpu.memory_space<vmem>>, %arg8: memref<1x128xf32, #tpu.memory_space<vmem>>, %arg9: memref<128x128xf32, #tpu.memory_space<vmem>>, %arg10: memref<1x128xf32, #tpu.memory_space<vmem>>, %arg11: memref<2x128xf32, #tpu.memory_space<vmem>>, %arg12: memref<32x128xf32, #tpu.memory_space<vmem>>, %arg13: memref<6x128xf32, #tpu.memory_space<vmem>>) attributes {dimension_semantics = [], scalar_prefetch = 0 : i64, scratch_operands = 2 : i64, tpu.core_type = #tpu.core_type<tc>} {
    %c0 = arith.constant 0 : index
    %c0_0 = arith.constant 0 : index
    %c0_1 = arith.constant 0 : index
    %0 = vector.load %arg0[%c0, %c0_0, %c0_1] : memref<2x32x384xf32, #tpu.memory_space<vmem>>, vector<1x32x384xf32>
    %1 = vector.shape_cast %0 : vector<1x32x384xf32> to vector<32x384xf32>
    %c0_2 = arith.constant 0 : index
    %c0_3 = arith.constant 0 : index
    %c0_4 = arith.constant 0 : index
    %2 = vector.load %arg1[%c0_2, %c0_3, %c0_4] : memref<2x384x128xf32, #tpu.memory_space<vmem>>, vector<1x384x128xf32>
    %3 = vector.shape_cast %2 : vector<1x384x128xf32> to vector<384x128xf32>
    %cst = arith.constant dense<0.000000e+00> : vector<32x128xf32>
    %4 = tpu.matmul %1, %3, %cst {dimension_numbers = #tpu.dot_dimension_numbers<[1], [0], [0], [1], [0, 0, 1, 1], [], []>} : vector<32x384xf32>, vector<384x128xf32>, vector<32x128xf32> -> vector<32x128xf32>
    %c1 = arith.constant 1 : index
    %c0_5 = arith.constant 0 : index
    %c0_6 = arith.constant 0 : index
    %5 = vector.load %arg1[%c1, %c0_5, %c0_6] : memref<2x384x128xf32, #tpu.memory_space<vmem>>, vector<1x384x128xf32>
    %6 = vector.shape_cast %5 : vector<1x384x128xf32> to vector<384x128xf32>
    %cst_7 = arith.constant dense<0.000000e+00> : vector<32x128xf32>
    %7 = tpu.matmul %1, %6, %cst_7 {dimension_numbers = #tpu.dot_dimension_numbers<[1], [0], [0], [1], [0, 0, 1, 1], [], []>} : vector<32x384xf32>, vector<384x128xf32>, vector<32x128xf32> -> vector<32x128xf32>
    %c1_8 = arith.constant 1 : index
    %c0_9 = arith.constant 0 : index
    %c0_10 = arith.constant 0 : index
    %8 = vector.load %arg0[%c1_8, %c0_9, %c0_10] : memref<2x32x384xf32, #tpu.memory_space<vmem>>, vector<1x32x384xf32>
    %9 = vector.shape_cast %8 : vector<1x32x384xf32> to vector<32x384xf32>
    %c0_11 = arith.constant 0 : index
    %c0_12 = arith.constant 0 : index
    %c0_13 = arith.constant 0 : index
    %10 = vector.load %arg1[%c0_11, %c0_12, %c0_13] : memref<2x384x128xf32, #tpu.memory_space<vmem>>, vector<1x384x128xf32>
    %11 = vector.shape_cast %10 : vector<1x384x128xf32> to vector<384x128xf32>
    %cst_14 = arith.constant dense<0.000000e+00> : vector<32x128xf32>
    %12 = tpu.matmul %9, %11, %cst_14 {dimension_numbers = #tpu.dot_dimension_numbers<[1], [0], [0], [1], [0, 0, 1, 1], [], []>} : vector<32x384xf32>, vector<384x128xf32>, vector<32x128xf32> -> vector<32x128xf32>
    %c1_15 = arith.constant 1 : index
    %c0_16 = arith.constant 0 : index
    %c0_17 = arith.constant 0 : index
    %13 = vector.load %arg1[%c1_15, %c0_16, %c0_17] : memref<2x384x128xf32, #tpu.memory_space<vmem>>, vector<1x384x128xf32>
    %14 = vector.shape_cast %13 : vector<1x384x128xf32> to vector<384x128xf32>
    %cst_18 = arith.constant dense<0.000000e+00> : vector<32x128xf32>
    %15 = tpu.matmul %9, %14, %cst_18 {dimension_numbers = #tpu.dot_dimension_numbers<[1], [0], [0], [1], [0, 0, 1, 1], [], []>} : vector<32x384xf32>, vector<384x128xf32>, vector<32x128xf32> -> vector<32x128xf32>
    %16 = arith.maximumf %4, %7 : vector<32x128xf32>
    %17 = arith.maximumf %12, %15 : vector<32x128xf32>
    %18 = arith.maximumf %16, %17 : vector<32x128xf32>
    %c0_19 = arith.constant 0 : index
    %c0_20 = arith.constant 0 : index
    %19 = vector.load %arg2[%c0_19, %c0_20] : memref<1x128xf32, #tpu.memory_space<vmem>>, vector<1x128xf32>
    %20 = vector.broadcast %19 : vector<1x128xf32> to vector<32x128xf32>
    %21 = arith.addf %18, %20 : vector<32x128xf32>
    %cst_21 = arith.constant 0.000000e+00 : f32
    %22 = vector.broadcast %cst_21 : f32 to vector<32x128xf32>
    %23 = arith.maximumf %21, %22 : vector<32x128xf32>
    %c0_22 = arith.constant 0 : index
    %c0_23 = arith.constant 0 : index
    %24 = vector.load %arg12[%c0_22, %c0_23] : memref<32x128xf32, #tpu.memory_space<vmem>>, vector<32x128xf32>
    tpu.vector_store %arg12[%c0_22, %c0_23], %23 {strides = array<i32>} : memref<32x128xf32, #tpu.memory_space<vmem>>, vector<32x128xf32>,
    %c0_24 = arith.constant 0 : index
    %c0_25 = arith.constant 0 : index
    %25 = vector.load %arg12[%c0_24, %c0_25] : memref<32x128xf32, #tpu.memory_space<vmem>>, vector<6x128xf32>
    %c8 = arith.constant 8 : index
    %c0_26 = arith.constant 0 : index
    %26 = vector.load %arg12[%c8, %c0_26] : memref<32x128xf32, #tpu.memory_space<vmem>>, vector<6x128xf32>
    %c1_27 = arith.constant 1 : index
    %c0_28 = arith.constant 0 : index
    %27 = vector.load %arg12[%c1_27, %c0_28] : memref<32x128xf32, #tpu.memory_space<vmem>>, vector<6x128xf32>
    %28 = tpu.concatenate %25, %26, %27 in 1 : vector<6x128xf32>, vector<6x128xf32>, vector<6x128xf32> -> vector<6x384xf32>
    %c0_29 = arith.constant 0 : index
    %c0_30 = arith.constant 0 : index
    %c0_31 = arith.constant 0 : index
    %29 = vector.load %arg3[%c0_29, %c0_30, %c0_31] : memref<2x384x128xf32, #tpu.memory_space<vmem>>, vector<1x384x128xf32>
    %30 = vector.shape_cast %29 : vector<1x384x128xf32> to vector<384x128xf32>
    %cst_32 = arith.constant dense<0.000000e+00> : vector<6x128xf32>
    %31 = tpu.matmul %28, %30, %cst_32 {dimension_numbers = #tpu.dot_dimension_numbers<[1], [0], [0], [1], [0, 0, 1, 1], [], []>} : vector<6x384xf32>, vector<384x128xf32>, vector<6x128xf32> -> vector<6x128xf32>
    %c1_33 = arith.constant 1 : index
    %c0_34 = arith.constant 0 : index
    %c0_35 = arith.constant 0 : index
    %32 = vector.load %arg3[%c1_33, %c0_34, %c0_35] : memref<2x384x128xf32, #tpu.memory_space<vmem>>, vector<1x384x128xf32>
    %33 = vector.shape_cast %32 : vector<1x384x128xf32> to vector<384x128xf32>
    %cst_36 = arith.constant dense<0.000000e+00> : vector<6x128xf32>
    %34 = tpu.matmul %28, %33, %cst_36 {dimension_numbers = #tpu.dot_dimension_numbers<[1], [0], [0], [1], [0, 0, 1, 1], [], []>} : vector<6x384xf32>, vector<384x128xf32>, vector<6x128xf32> -> vector<6x128xf32>
    %c8_37 = arith.constant 8 : index
    %c0_38 = arith.constant 0 : index
    %35 = vector.load %arg12[%c8_37, %c0_38] : memref<32x128xf32, #tpu.memory_space<vmem>>, vector<6x128xf32>
    %c1_39 = arith.constant 1 : index
    %c0_40 = arith.constant 0 : index
    %36 = vector.load %arg12[%c1_39, %c0_40] : memref<32x128xf32, #tpu.memory_space<vmem>>, vector<6x128xf32>
    %c9 = arith.constant 9 : index
    %c0_41 = arith.constant 0 : index
    %37 = vector.load %arg12[%c9, %c0_41] : memref<32x128xf32, #tpu.memory_space<vmem>>, vector<6x128xf32>
    %38 = tpu.concatenate %35, %36, %37 in 1 : vector<6x128xf32>, vector<6x128xf32>, vector<6x128xf32> -> vector<6x384xf32>
    %c0_42 = arith.constant 0 : index
    %c0_43 = arith.constant 0 : index
    %c0_44 = arith.constant 0 : index
    %39 = vector.load %arg3[%c0_42, %c0_43, %c0_44] : memref<2x384x128xf32, #tpu.memory_space<vmem>>, vector<1x384x128xf32>
    %40 = vector.shape_cast %39 : vector<1x384x128xf32> to vector<384x128xf32>
    %cst_45 = arith.constant dense<0.000000e+00> : vector<6x128xf32>
    %41 = tpu.matmul %38, %40, %cst_45 {dimension_numbers = #tpu.dot_dimension_numbers<[1], [0], [0], [1], [0, 0, 1, 1], [], []>} : vector<6x384xf32>, vector<384x128xf32>, vector<6x128xf32> -> vector<6x128xf32>
    %c1_46 = arith.constant 1 : index
    %c0_47 = arith.constant 0 : index
    %c0_48 = arith.constant 0 : index
    %42 = vector.load %arg3[%c1_46, %c0_47, %c0_48] : memref<2x384x128xf32, #tpu.memory_space<vmem>>, vector<1x384x128xf32>
    %43 = vector.shape_cast %42 : vector<1x384x128xf32> to vector<384x128xf32>
    %cst_49 = arith.constant dense<0.000000e+00> : vector<6x128xf32>
    %44 = tpu.matmul %38, %43, %cst_49 {dimension_numbers = #tpu.dot_dimension_numbers<[1], [0], [0], [1], [0, 0, 1, 1], [], []>} : vector<6x384xf32>, vector<384x128xf32>, vector<6x128xf32> -> vector<6x128xf32>
    %45 = arith.maximumf %31, %34 : vector<6x128xf32>
    %46 = arith.maximumf %41, %44 : vector<6x128xf32>
    %47 = arith.maximumf %45, %46 : vector<6x128xf32>
    %c0_50 = arith.constant 0 : index
    %c0_51 = arith.constant 0 : index
    %48 = vector.load %arg4[%c0_50, %c0_51] : memref<1x128xf32, #tpu.memory_space<vmem>>, vector<1x128xf32>
    %49 = vector.broadcast %48 : vector<1x128xf32> to vector<6x128xf32>
    %50 = arith.addf %47, %49 : vector<6x128xf32>
    %cst_52 = arith.constant 0.000000e+00 : f32
    %51 = vector.broadcast %cst_52 : f32 to vector<6x128xf32>
    %52 = arith.maximumf %50, %51 : vector<6x128xf32>
    %c0_53 = arith.constant 0 : index
    %c0_54 = arith.constant 0 : index
    %53 = vector.load %arg13[%c0_53, %c0_54] : memref<6x128xf32, #tpu.memory_space<vmem>>, vector<6x128xf32>
    tpu.vector_store %arg13[%c0_53, %c0_54], %52 {strides = array<i32>} : memref<6x128xf32, #tpu.memory_space<vmem>>, vector<6x128xf32>,
    %c0_55 = arith.constant 0 : index
    %c0_56 = arith.constant 0 : index
    %54 = vector.load %arg13[%c0_55, %c0_56] : memref<6x128xf32, #tpu.memory_space<vmem>>, vector<1x128xf32>
    %c0_57 = arith.constant 0 : index
    %c0_58 = arith.constant 0 : index
    %c0_59 = arith.constant 0 : index
    %55 = vector.load %arg5[%c0_57, %c0_58, %c0_59] : memref<6x128x128xf32, #tpu.memory_space<vmem>>, vector<1x128x128xf32>
    %56 = vector.shape_cast %55 : vector<1x128x128xf32> to vector<128x128xf32>
    %cst_60 = arith.constant dense<0.000000e+00> : vector<1x128xf32>
    %57 = tpu.matmul %54, %56, %cst_60 {dimension_numbers = #tpu.dot_dimension_numbers<[1], [0], [0], [1], [0, 0, 1, 1], [], []>} : vector<1x128xf32>, vector<128x128xf32>, vector<1x128xf32> -> vector<1x128xf32>
    %c1_61 = arith.constant 1 : index
    %c0_62 = arith.constant 0 : index
    %58 = vector.load %arg13[%c1_61, %c0_62] : memref<6x128xf32, #tpu.memory_space<vmem>>, vector<1x128xf32>
    %c1_63 = arith.constant 1 : index
    %c0_64 = arith.constant 0 : index
    %c0_65 = arith.constant 0 : index
    %59 = vector.load %arg5[%c1_63, %c0_64, %c0_65] : memref<6x128x128xf32, #tpu.memory_space<vmem>>, vector<1x128x128xf32>
    %60 = vector.shape_cast %59 : vector<1x128x128xf32> to vector<128x128xf32>
    %cst_66 = arith.constant dense<0.000000e+00> : vector<1x128xf32>
    %61 = tpu.matmul %58, %60, %cst_66 {dimension_numbers = #tpu.dot_dimension_numbers<[1], [0], [0], [1], [0, 0, 1, 1], [], []>} : vector<1x128xf32>, vector<128x128xf32>, vector<1x128xf32> -> vector<1x128xf32>
    %62 = arith.addf %57, %61 : vector<1x128xf32>
    %c2 = arith.constant 2 : index
    %c0_67 = arith.constant 0 : index
    %63 = vector.load %arg13[%c2, %c0_67] : memref<6x128xf32, #tpu.memory_space<vmem>>, vector<1x128xf32>
    %c2_68 = arith.constant 2 : index
    %c0_69 = arith.constant 0 : index
    %c0_70 = arith.constant 0 : index
    %64 = vector.load %arg5[%c2_68, %c0_69, %c0_70] : memref<6x128x128xf32, #tpu.memory_space<vmem>>, vector<1x128x128xf32>
    %65 = vector.shape_cast %64 : vector<1x128x128xf32> to vector<128x128xf32>
    %cst_71 = arith.constant dense<0.000000e+00> : vector<1x128xf32>
    %66 = tpu.matmul %63, %65, %cst_71 {dimension_numbers = #tpu.dot_dimension_numbers<[1], [0], [0], [1], [0, 0, 1, 1], [], []>} : vector<1x128xf32>, vector<128x128xf32>, vector<1x128xf32> -> vector<1x128xf32>
    %67 = arith.addf %62, %66 : vector<1x128xf32>
    %c3 = arith.constant 3 : index
    %c0_72 = arith.constant 0 : index
    %68 = vector.load %arg13[%c3, %c0_72] : memref<6x128xf32, #tpu.memory_space<vmem>>, vector<1x128xf32>
    %c3_73 = arith.constant 3 : index
    %c0_74 = arith.constant 0 : index
    %c0_75 = arith.constant 0 : index
    %69 = vector.load %arg5[%c3_73, %c0_74, %c0_75] : memref<6x128x128xf32, #tpu.memory_space<vmem>>, vector<1x128x128xf32>
    %70 = vector.shape_cast %69 : vector<1x128x128xf32> to vector<128x128xf32>
    %cst_76 = arith.constant dense<0.000000e+00> : vector<1x128xf32>
    %71 = tpu.matmul %68, %70, %cst_76 {dimension_numbers = #tpu.dot_dimension_numbers<[1], [0], [0], [1], [0, 0, 1, 1], [], []>} : vector<1x128xf32>, vector<128x128xf32>, vector<1x128xf32> -> vector<1x128xf32>
    %72 = arith.addf %67, %71 : vector<1x128xf32>
    %c4 = arith.constant 4 : index
    %c0_77 = arith.constant 0 : index
    %73 = vector.load %arg13[%c4, %c0_77] : memref<6x128xf32, #tpu.memory_space<vmem>>, vector<1x128xf32>
    %c4_78 = arith.constant 4 : index
    %c0_79 = arith.constant 0 : index
    %c0_80 = arith.constant 0 : index
    %74 = vector.load %arg5[%c4_78, %c0_79, %c0_80] : memref<6x128x128xf32, #tpu.memory_space<vmem>>, vector<1x128x128xf32>
    %75 = vector.shape_cast %74 : vector<1x128x128xf32> to vector<128x128xf32>
    %cst_81 = arith.constant dense<0.000000e+00> : vector<1x128xf32>
    %76 = tpu.matmul %73, %75, %cst_81 {dimension_numbers = #tpu.dot_dimension_numbers<[1], [0], [0], [1], [0, 0, 1, 1], [], []>} : vector<1x128xf32>, vector<128x128xf32>, vector<1x128xf32> -> vector<1x128xf32>
    %77 = arith.addf %72, %76 : vector<1x128xf32>
    %c5 = arith.constant 5 : index
    %c0_82 = arith.constant 0 : index
    %78 = vector.load %arg13[%c5, %c0_82] : memref<6x128xf32, #tpu.memory_space<vmem>>, vector<1x128xf32>
    %c5_83 = arith.constant 5 : index
    %c0_84 = arith.constant 0 : index
    %c0_85 = arith.constant 0 : index
    %79 = vector.load %arg5[%c5_83, %c0_84, %c0_85] : memref<6x128x128xf32, #tpu.memory_space<vmem>>, vector<1x128x128xf32>
    %80 = vector.shape_cast %79 : vector<1x128x128xf32> to vector<128x128xf32>
    %cst_86 = arith.constant dense<0.000000e+00> : vector<1x128xf32>
    %81 = tpu.matmul %78, %80, %cst_86 {dimension_numbers = #tpu.dot_dimension_numbers<[1], [0], [0], [1], [0, 0, 1, 1], [], []>} : vector<1x128xf32>, vector<128x128xf32>, vector<1x128xf32> -> vector<1x128xf32>
    %82 = arith.addf %77, %81 : vector<1x128xf32>
    %c16 = arith.constant 16 : index
    %c0_87 = arith.constant 0 : index
    %83 = vector.load %arg12[%c16, %c0_87] : memref<32x128xf32, #tpu.memory_space<vmem>>, vector<6x128xf32>
    %c24 = arith.constant 24 : index
    %c0_88 = arith.constant 0 : index
    %84 = vector.load %arg12[%c24, %c0_88] : memref<32x128xf32, #tpu.memory_space<vmem>>, vector<6x128xf32>
    %c17 = arith.constant 17 : index
    %c0_89 = arith.constant 0 : index
    %85 = vector.load %arg12[%c17, %c0_89] : memref<32x128xf32, #tpu.memory_space<vmem>>, vector<6x128xf32>
    %86 = tpu.concatenate %83, %84, %85 in 1 : vector<6x128xf32>, vector<6x128xf32>, vector<6x128xf32> -> vector<6x384xf32>
    %c0_90 = arith.constant 0 : index
    %c0_91 = arith.constant 0 : index
    %c0_92 = arith.constant 0 : index
    %87 = vector.load %arg3[%c0_90, %c0_91, %c0_92] : memref<2x384x128xf32, #tpu.memory_space<vmem>>, vector<1x384x128xf32>
    %88 = vector.shape_cast %87 : vector<1x384x128xf32> to vector<384x128xf32>
    %cst_93 = arith.constant dense<0.000000e+00> : vector<6x128xf32>
    %89 = tpu.matmul %86, %88, %cst_93 {dimension_numbers = #tpu.dot_dimension_numbers<[1], [0], [0], [1], [0, 0, 1, 1], [], []>} : vector<6x384xf32>, vector<384x128xf32>, vector<6x128xf32> -> vector<6x128xf32>
    %c1_94 = arith.constant 1 : index
    %c0_95 = arith.constant 0 : index
    %c0_96 = arith.constant 0 : index
    %90 = vector.load %arg3[%c1_94, %c0_95, %c0_96] : memref<2x384x128xf32, #tpu.memory_space<vmem>>, vector<1x384x128xf32>
    %91 = vector.shape_cast %90 : vector<1x384x128xf32> to vector<384x128xf32>
    %cst_97 = arith.constant dense<0.000000e+00> : vector<6x128xf32>
    %92 = tpu.matmul %86, %91, %cst_97 {dimension_numbers = #tpu.dot_dimension_numbers<[1], [0], [0], [1], [0, 0, 1, 1], [], []>} : vector<6x384xf32>, vector<384x128xf32>, vector<6x128xf32> -> vector<6x128xf32>
    %c24_98 = arith.constant 24 : index
    %c0_99 = arith.constant 0 : index
    %93 = vector.load %arg12[%c24_98, %c0_99] : memref<32x128xf32, #tpu.memory_space<vmem>>, vector<6x128xf32>
    %c17_100 = arith.constant 17 : index
    %c0_101 = arith.constant 0 : index
    %94 = vector.load %arg12[%c17_100, %c0_101] : memref<32x128xf32, #tpu.memory_space<vmem>>, vector<6x128xf32>
    %c25 = arith.constant 25 : index
    %c0_102 = arith.constant 0 : index
    %95 = vector.load %arg12[%c25, %c0_102] : memref<32x128xf32, #tpu.memory_space<vmem>>, vector<6x128xf32>
    %96 = tpu.concatenate %93, %94, %95 in 1 : vector<6x128xf32>, vector<6x128xf32>, vector<6x128xf32> -> vector<6x384xf32>
    %c0_103 = arith.constant 0 : index
    %c0_104 = arith.constant 0 : index
    %c0_105 = arith.constant 0 : index
    %97 = vector.load %arg3[%c0_103, %c0_104, %c0_105] : memref<2x384x128xf32, #tpu.memory_space<vmem>>, vector<1x384x128xf32>
    %98 = vector.shape_cast %97 : vector<1x384x128xf32> to vector<384x128xf32>
    %cst_106 = arith.constant dense<0.000000e+00> : vector<6x128xf32>
    %99 = tpu.matmul %96, %98, %cst_106 {dimension_numbers = #tpu.dot_dimension_numbers<[1], [0], [0], [1], [0, 0, 1, 1], [], []>} : vector<6x384xf32>, vector<384x128xf32>, vector<6x128xf32> -> vector<6x128xf32>
    %c1_107 = arith.constant 1 : index
    %c0_108 = arith.constant 0 : index
    %c0_109 = arith.constant 0 : index
    %100 = vector.load %arg3[%c1_107, %c0_108, %c0_109] : memref<2x384x128xf32, #tpu.memory_space<vmem>>, vector<1x384x128xf32>
    %101 = vector.shape_cast %100 : vector<1x384x128xf32> to vector<384x128xf32>
    %cst_110 = arith.constant dense<0.000000e+00> : vector<6x128xf32>
    %102 = tpu.matmul %96, %101, %cst_110 {dimension_numbers = #tpu.dot_dimension_numbers<[1], [0], [0], [1], [0, 0, 1, 1], [], []>} : vector<6x384xf32>, vector<384x128xf32>, vector<6x128xf32> -> vector<6x128xf32>
    %103 = arith.maximumf %89, %92 : vector<6x128xf32>
    %104 = arith.maximumf %99, %102 : vector<6x128xf32>
    %105 = arith.maximumf %103, %104 : vector<6x128xf32>
    %c0_111 = arith.constant 0 : index
    %c0_112 = arith.constant 0 : index
    %106 = vector.load %arg4[%c0_111, %c0_112] : memref<1x128xf32, #tpu.memory_space<vmem>>, vector<1x128xf32>
    %107 = vector.broadcast %106 : vector<1x128xf32> to vector<6x128xf32>
    %108 = arith.addf %105, %107 : vector<6x128xf32>
    %cst_113 = arith.constant 0.000000e+00 : f32
    %109 = vector.broadcast %cst_113 : f32 to vector<6x128xf32>
    %110 = arith.maximumf %108, %109 : vector<6x128xf32>
    %c0_114 = arith.constant 0 : index
    %c0_115 = arith.constant 0 : index
    %111 = vector.load %arg13[%c0_114, %c0_115] : memref<6x128xf32, #tpu.memory_space<vmem>>, vector<6x128xf32>
    tpu.vector_store %arg13[%c0_114, %c0_115], %110 {strides = array<i32>} : memref<6x128xf32, #tpu.memory_space<vmem>>, vector<6x128xf32>,
    %c0_116 = arith.constant 0 : index
    %c0_117 = arith.constant 0 : index
    %112 = vector.load %arg13[%c0_116, %c0_117] : memref<6x128xf32, #tpu.memory_space<vmem>>, vector<1x128xf32>
    %c0_118 = arith.constant 0 : index
    %c0_119 = arith.constant 0 : index
    %c0_120 = arith.constant 0 : index
    %113 = vector.load %arg5[%c0_118, %c0_119, %c0_120] : memref<6x128x128xf32, #tpu.memory_space<vmem>>, vector<1x128x128xf32>
    %114 = vector.shape_cast %113 : vector<1x128x128xf32> to vector<128x128xf32>
    %cst_121 = arith.constant dense<0.000000e+00> : vector<1x128xf32>
    %115 = tpu.matmul %112, %114, %cst_121 {dimension_numbers = #tpu.dot_dimension_numbers<[1], [0], [0], [1], [0, 0, 1, 1], [], []>} : vector<1x128xf32>, vector<128x128xf32>, vector<1x128xf32> -> vector<1x128xf32>
    %c1_122 = arith.constant 1 : index
    %c0_123 = arith.constant 0 : index
    %116 = vector.load %arg13[%c1_122, %c0_123] : memref<6x128xf32, #tpu.memory_space<vmem>>, vector<1x128xf32>
    %c1_124 = arith.constant 1 : index
    %c0_125 = arith.constant 0 : index
    %c0_126 = arith.constant 0 : index
    %117 = vector.load %arg5[%c1_124, %c0_125, %c0_126] : memref<6x128x128xf32, #tpu.memory_space<vmem>>, vector<1x128x128xf32>
    %118 = vector.shape_cast %117 : vector<1x128x128xf32> to vector<128x128xf32>
    %cst_127 = arith.constant dense<0.000000e+00> : vector<1x128xf32>
    %119 = tpu.matmul %116, %118, %cst_127 {dimension_numbers = #tpu.dot_dimension_numbers<[1], [0], [0], [1], [0, 0, 1, 1], [], []>} : vector<1x128xf32>, vector<128x128xf32>, vector<1x128xf32> -> vector<1x128xf32>
    %120 = arith.addf %115, %119 : vector<1x128xf32>
    %c2_128 = arith.constant 2 : index
    %c0_129 = arith.constant 0 : index
    %121 = vector.load %arg13[%c2_128, %c0_129] : memref<6x128xf32, #tpu.memory_space<vmem>>, vector<1x128xf32>
    %c2_130 = arith.constant 2 : index
    %c0_131 = arith.constant 0 : index
    %c0_132 = arith.constant 0 : index
    %122 = vector.load %arg5[%c2_130, %c0_131, %c0_132] : memref<6x128x128xf32, #tpu.memory_space<vmem>>, vector<1x128x128xf32>
    %123 = vector.shape_cast %122 : vector<1x128x128xf32> to vector<128x128xf32>
    %cst_133 = arith.constant dense<0.000000e+00> : vector<1x128xf32>
    %124 = tpu.matmul %121, %123, %cst_133 {dimension_numbers = #tpu.dot_dimension_numbers<[1], [0], [0], [1], [0, 0, 1, 1], [], []>} : vector<1x128xf32>, vector<128x128xf32>, vector<1x128xf32> -> vector<1x128xf32>
    %125 = arith.addf %120, %124 : vector<1x128xf32>
    %c3_134 = arith.constant 3 : index
    %c0_135 = arith.constant 0 : index
    %126 = vector.load %arg13[%c3_134, %c0_135] : memref<6x128xf32, #tpu.memory_space<vmem>>, vector<1x128xf32>
    %c3_136 = arith.constant 3 : index
    %c0_137 = arith.constant 0 : index
    %c0_138 = arith.constant 0 : index
    %127 = vector.load %arg5[%c3_136, %c0_137, %c0_138] : memref<6x128x128xf32, #tpu.memory_space<vmem>>, vector<1x128x128xf32>
    %128 = vector.shape_cast %127 : vector<1x128x128xf32> to vector<128x128xf32>
    %cst_139 = arith.constant dense<0.000000e+00> : vector<1x128xf32>
    %129 = tpu.matmul %126, %128, %cst_139 {dimension_numbers = #tpu.dot_dimension_numbers<[1], [0], [0], [1], [0, 0, 1, 1], [], []>} : vector<1x128xf32>, vector<128x128xf32>, vector<1x128xf32> -> vector<1x128xf32>
    %130 = arith.addf %125, %129 : vector<1x128xf32>
    %c4_140 = arith.constant 4 : index
    %c0_141 = arith.constant 0 : index
    %131 = vector.load %arg13[%c4_140, %c0_141] : memref<6x128xf32, #tpu.memory_space<vmem>>, vector<1x128xf32>
    %c4_142 = arith.constant 4 : index
    %c0_143 = arith.constant 0 : index
    %c0_144 = arith.constant 0 : index
    %132 = vector.load %arg5[%c4_142, %c0_143, %c0_144] : memref<6x128x128xf32, #tpu.memory_space<vmem>>, vector<1x128x128xf32>
    %133 = vector.shape_cast %132 : vector<1x128x128xf32> to vector<128x128xf32>
    %cst_145 = arith.constant dense<0.000000e+00> : vector<1x128xf32>
    %134 = tpu.matmul %131, %133, %cst_145 {dimension_numbers = #tpu.dot_dimension_numbers<[1], [0], [0], [1], [0, 0, 1, 1], [], []>} : vector<1x128xf32>, vector<128x128xf32>, vector<1x128xf32> -> vector<1x128xf32>
    %135 = arith.addf %130, %134 : vector<1x128xf32>
    %c5_146 = arith.constant 5 : index
    %c0_147 = arith.constant 0 : index
    %136 = vector.load %arg13[%c5_146, %c0_147] : memref<6x128xf32, #tpu.memory_space<vmem>>, vector<1x128xf32>
    %c5_148 = arith.constant 5 : index
    %c0_149 = arith.constant 0 : index
    %c0_150 = arith.constant 0 : index
    %137 = vector.load %arg5[%c5_148, %c0_149, %c0_150] : memref<6x128x128xf32, #tpu.memory_space<vmem>>, vector<1x128x128xf32>
    %138 = vector.shape_cast %137 : vector<1x128x128xf32> to vector<128x128xf32>
    %cst_151 = arith.constant dense<0.000000e+00> : vector<1x128xf32>
    %139 = tpu.matmul %136, %138, %cst_151 {dimension_numbers = #tpu.dot_dimension_numbers<[1], [0], [0], [1], [0, 0, 1, 1], [], []>} : vector<1x128xf32>, vector<128x128xf32>, vector<1x128xf32> -> vector<1x128xf32>
    %140 = arith.addf %135, %139 : vector<1x128xf32>
    %141 = tpu.concatenate %82, %140 in 0 : vector<1x128xf32>, vector<1x128xf32> -> vector<2x128xf32>
    %c0_152 = arith.constant 0 : index
    %c0_153 = arith.constant 0 : index
    %142 = vector.load %arg6[%c0_152, %c0_153] : memref<1x128xf32, #tpu.memory_space<vmem>>, vector<1x128xf32>
    %143 = vector.broadcast %142 : vector<1x128xf32> to vector<2x128xf32>
    %144 = arith.addf %141, %143 : vector<2x128xf32>
    %cst_154 = arith.constant 0.000000e+00 : f32
    %145 = vector.broadcast %cst_154 : f32 to vector<2x128xf32>
    %146 = arith.maximumf %144, %145 : vector<2x128xf32>
    %c0_155 = arith.constant 0 : index
    %c0_156 = arith.constant 0 : index
    %147 = vector.load %arg7[%c0_155, %c0_156] : memref<128x128xf32, #tpu.memory_space<vmem>>, vector<128x128xf32>
    %cst_157 = arith.constant dense<0.000000e+00> : vector<2x128xf32>
    %148 = tpu.matmul %146, %147, %cst_157 {dimension_numbers = #tpu.dot_dimension_numbers<[1], [0], [0], [1], [0, 0, 1, 1], [], []>} : vector<2x128xf32>, vector<128x128xf32>, vector<2x128xf32> -> vector<2x128xf32>
    %c0_158 = arith.constant 0 : index
    %c0_159 = arith.constant 0 : index
    %149 = vector.load %arg8[%c0_158, %c0_159] : memref<1x128xf32, #tpu.memory_space<vmem>>, vector<1x128xf32>
    %150 = vector.broadcast %149 : vector<1x128xf32> to vector<2x128xf32>
    %151 = arith.addf %148, %150 : vector<2x128xf32>
    %cst_160 = arith.constant 0.000000e+00 : f32
    %152 = vector.broadcast %cst_160 : f32 to vector<2x128xf32>
    %153 = arith.maximumf %151, %152 : vector<2x128xf32>
    %c0_161 = arith.constant 0 : index
    %c0_162 = arith.constant 0 : index
    %154 = vector.load %arg9[%c0_161, %c0_162] : memref<128x128xf32, #tpu.memory_space<vmem>>, vector<128x128xf32>
    %cst_163 = arith.constant dense<0.000000e+00> : vector<2x128xf32>
    %155 = tpu.matmul %153, %154, %cst_163 {dimension_numbers = #tpu.dot_dimension_numbers<[1], [0], [0], [1], [0, 0, 1, 1], [], []>} : vector<2x128xf32>, vector<128x128xf32>, vector<2x128xf32> -> vector<2x128xf32>
    %c0_164 = arith.constant 0 : index
    %c0_165 = arith.constant 0 : index
    %156 = vector.load %arg10[%c0_164, %c0_165] : memref<1x128xf32, #tpu.memory_space<vmem>>, vector<1x128xf32>
    %157 = vector.broadcast %156 : vector<1x128xf32> to vector<2x128xf32>
    %158 = arith.addf %155, %157 : vector<2x128xf32>
    %c0_166 = arith.constant 0 : index
    %c0_167 = arith.constant 0 : index
    %159 = vector.load %arg11[%c0_166, %c0_167] : memref<2x128xf32, #tpu.memory_space<vmem>>, vector<2x128xf32>
    tpu.vector_store %arg11[%c0_166, %c0_167], %158 {strides = array<i32>} : memref<2x128xf32, #tpu.memory_space<vmem>>, vector<2x128xf32>,
    return
  }
}

</mosaic_0001>

<bundles_post_ra>
// kernel: forward.1
= control target key start
LH: loop header
LB: loop body
LE: loop exit
PB: predicated region body
PF: predicated region fallthrough
CT: control target
= control target key end

     0   :  { %s8824_s0 = inlined_call_operand.vmem [shape: f32[2,32,384], index: 0, kind: input, shape index: {}]   ;;  %s8825_s1 = inlined_call_operand.vmem [shape: f32[2,384,128], index: 1, kind: input, shape index: {}]   ;;  %s8826_s2 = inlined_call_operand.vmem [shape: f32[1,128], index: 2, kind: input, shape index: {}]   ;;  %s8827_s3 = inlined_call_operand.vmem [shape: f32[2,384,128], index: 3, kind: input, shape index: {}]   ;;  %s8828_s4 = inlined_call_operand.vmem [shape: f32[1,128], index: 4, kind: input, shape index: {}]   ;;  %s8829_s5 = inlined_call_operand.vmem [shape: f32[6,128,128], index: 5, kind: input, shape index: {}]   ;;  %s8830_s6 = inlined_call_operand.vmem [shape: f32[1,128], index: 6, kind: input, shape index: {}]   ;;  %s8831_s7 = inlined_call_operand.vmem [shape: f32[128,128], index: 7, kind: input, shape index: {}]   ;;  %s8832_s8 = inlined_call_operand.vmem [shape: f32[1,128], index: 8, kind: input, shape index: {}]   ;;  %s8833_s9 = inlined_call_operand.vmem [shape: f32[128,128], index: 9, kind: input, shape index: {}]   ;;  %s8834_s10 = inlined_call_operand.vmem [shape: f32[1,128], index: 10, kind: input, shape index: {}]   ;;  %s8835_s11 = inlined_call_operand.hbm [shape: f32[2,128], index: 11, kind: output, shape index: {}]  }
   0x1   :  { %v67_v0 = vld [vmem:[%s8825_s1 + $0x80] sm:$0xff]  ;;  %v68_v1 = vld [vmem:[%s8825_s1 + $0x88] sm:$0xff]  ;;  %v69_v5 = vld [vmem:[%s8825_s1 + $0x90] sm:$0xff] }
   0x2   :  { %v51_v2 = vld [vmem:[%s8825_s1] sm:$0xff]  ;;  %v5646_v3 = vpack.c.bf16 %v68_v1, %v67_v0  ;;  %v52_v4 = vld [vmem:[%s8825_s1 + $0x8] sm:$0xff]  ;;  %v70_v6 = vld [vmem:[%s8825_s1 + $0x98] sm:$0xff] }
   0x3   :  { %v5648_v7 = vpack.c.bf16 %v52_v4, %v51_v2  ;;  %v5650_v8 = vpack.c.bf16 %v70_v6, %v69_v5  ;;  %v53_v9 = vld [vmem:[%s8825_s1 + $0x10] sm:$0xff]  ;;  %v54_v10 = vld [vmem:[%s8825_s1 + $0x18] sm:$0xff]  ;;  %v71_v11 = vld [vmem:[%s8825_s1 + $0xa0] sm:$0xff] }
   0x4   :  { %5647 = vmatprep.subr.bf16.mxu1 %v5646_v3  ;;  %v72_v12 = vld [vmem:[%s8825_s1 + $0xa8] sm:$0xff]  ;;  %5775 = vmatprep.subr.bf16.mxu0 %v5646_v3  ;;  %v5652_v13 = vpack.c.bf16 %v54_v10, %v53_v9  ;;  %v55_v15 = vld [vmem:[%s8825_s1 + $0x20] sm:$0xff]  ;;  %v73_v17 = vld [vmem:[%s8825_s1 + $0xb0] sm:$0xff] }
   0x5   :  { %5649 = vmatpush3.bf16.msra.mxu1 %v5648_v7  ;;  %5777 = vmatpush3.bf16.msra.mxu0 %v5648_v7  ;;  %v5654_v14 = vpack.c.bf16 %v72_v12, %v71_v11  ;;  %v56_v16 = vld [vmem:[%s8825_s1 + $0x28] sm:$0xff]  ;;  %v74_v18 = vld [vmem:[%s8825_s1 + $0xb8] sm:$0xff]  ;;  %v57_v21 = vld [vmem:[%s8825_s1 + $0x30] sm:$0xff] }
   0x6   :  { %5651 = vmatprep.subr.bf16.mxu1 %v5650_v8  ;;  %5779 = vmatprep.subr.bf16.mxu0 %v5650_v8  ;;  %v5656_v19 = vpack.c.bf16 %v56_v16, %v55_v15  ;;  %v5658_v20 = vpack.c.bf16 %v74_v18, %v73_v17  ;;  %v58_v22 = vld [vmem:[%s8825_s1 + $0x38] sm:$0xff]  ;;  %v75_v23 = vld [vmem:[%s8825_s1 + $0xc0] sm:$0xff]  ;;  %v76_v24 = vld [vmem:[%s8825_s1 + $0xc8] sm:$0xff] }
   0x7   :  { %v6855_v25 = vld [vmem:[%s8824_s0 + $0x8] sm:$0xff]  ;;  %v5660_v26 = vpack.c.bf16 %v58_v22, %v57_v21  ;;  %v5662_v27 = vpack.c.bf16 %v76_v24, %v75_v23  ;;  %v59_v28 = vld [vmem:[%s8825_s1 + $0x40] sm:$0xff]  ;;  %v77_v30 = vld [vmem:[%s8825_s1 + $0xd0] sm:$0xff] }
   0x8   :  { %163 = vmatprep.mubr.f32.mxu1 %v6855_v25  ;;  %v60_v29 = vld [vmem:[%s8825_s1 + $0x48] sm:$0xff]  ;;  %v78_v31 = vld [vmem:[%s8825_s1 + $0xd8] sm:$0xff]  ;;  %v61_v34 = vld [vmem:[%s8825_s1 + $0x50] sm:$0xff] }
   0x9   :  { %5653 = vmatpush3.bf16.msra.mxu1 %v5652_v13  ;;  %5781 = vmatpush3.bf16.msra.mxu0 %v5652_v13  ;;  %v5664_v32 = vpack.c.bf16 %v60_v29, %v59_v28  ;;  %v5666_v33 = vpack.c.bf16 %v78_v31, %v77_v30  ;;  %v62_v35 = vld [vmem:[%s8825_s1 + $0x58] sm:$0xff]  ;;  %v79_v36 = vld [vmem:[%s8825_s1 + $0xe0] sm:$0xff]  ;;  %v80_v37 = vld [vmem:[%s8825_s1 + $0xe8] sm:$0xff] }
   0xa   :  { %5655 = vmatprep.subr.bf16.mxu1 %v5654_v14  ;;  %5783 = vmatprep.subr.bf16.mxu0 %v5654_v14  ;;  %v5668_v38 = vpack.c.bf16 %v62_v35, %v61_v34  ;;  %v5670_v39 = vpack.c.bf16 %v80_v37, %v79_v36  ;;  %v63_v40 = vld [vmem:[%s8825_s1 + $0x60] sm:$0xff]  ;;  %v64_v41 = vld [vmem:[%s8825_s1 + $0x68] sm:$0xff]  ;;  %v81_v42 = vld [vmem:[%s8825_s1 + $0xf0] sm:$0xff] }
   0xb   :  { %v82_v43 = vld [vmem:[%s8825_s1 + $0xf8] sm:$0xff]  ;;  %v5672_v44 = vpack.c.bf16 %v64_v41, %v63_v40  ;;  %v65_v46 = vld [vmem:[%s8825_s1 + $0x70] sm:$0xff]  ;;  %v83_v48 = vld [vmem:[%s8825_s1 + $0x100] sm:$0xff] }
   0xc   :  { %v5674_v45 = vpack.c.bf16 %v82_v43, %v81_v42  ;;  %v66_v47 = vld [vmem:[%s8825_s1 + $0x78] sm:$0xff]  ;;  %v84_v49 = vld [vmem:[%s8825_s1 + $0x108] sm:$0xff]  ;;  %v3508_v51 = vld [vmem:[%s8825_s1 + $0x200] sm:$0xff] }
   0xd   :  { %5657 = vmatpush3.bf16.msra.mxu1 %v5656_v19  ;;  %5785 = vmatpush3.bf16.msra.mxu0 %v5656_v19  ;;  %v5676_v50 = vpack.c.bf16 %v66_v47, %v65_v46  ;;  %v3509_v52 = vld [vmem:[%s8825_s1 + $0x208] sm:$0xff]  ;;  %v6912_v53 = vpack.c.bf16 %v84_v49, %v83_v48  ;;  %v85_v54 = vld [vmem:[%s8825_s1 + $0x110] sm:$0xff]  ;;  %v86_v55 = vld [vmem:[%s8825_s1 + $0x118] sm:$0xff] }
   0xe   :  { %5659 = vmatprep.subr.bf16.mxu1 %v5658_v20  ;;  %5787 = vmatprep.subr.bf16.mxu0 %v5658_v20  ;;  %v6920_v56 = vpack.c.bf16 %v3509_v52, %v3508_v51  ;;  %v6925_v57 = vld [vmem:[%s8824_s0] sm:$0xff]  ;;  %v6928_v58 = vpack.c.bf16 %v86_v55, %v85_v54  ;;  %v88_v61 = vld [vmem:[%s8825_s1 + $0x128] sm:$0xff]  ;;  %v6952_v0 = vld [vmem:[%s8824_s0 + $0x18] sm:$0xff] }
   0xf   :  { %v87_v59 = vld [vmem:[%s8825_s1 + $0x120] sm:$0xff]  ;;  %v3493_v63 = vld [vmem:[%s8825_s1 + $0x188] sm:$0xff]  ;;  %v3510_v1 = vld [vmem:[%s8825_s1 + $0x210] sm:$0xff] }
  0x10   :  { %v6936_v60 = vld [vmem:[%s8824_s0 + $0x20] sm:$0xff]  ;;  %v3511_v2 = vld [vmem:[%s8825_s1 + $0x218] sm:$0xff]  ;;  %v6965_v3 = vld [vmem:[%s8824_s0 + $0x68] sm:$0xff]  ;;  %v6973_v5 = vpack.c.bf16 %v88_v61, %v87_v59 }
  0x11   :  { %5661 = vmatpush3.bf16.msra.mxu1 %v5660_v26  ;;  %5789 = vmatpush3.bf16.msra.mxu0 %v5660_v26  ;;  %v3492_v62 = vld [vmem:[%s8825_s1 + $0x180] sm:$0xff]  ;;  %v89_v6 = vld [vmem:[%s8825_s1 + $0x130] sm:$0xff]  ;;  %v90_v7 = vld [vmem:[%s8825_s1 + $0x138] sm:$0xff] }
  0x12   :  { %5663 = vmatprep.subr.bf16.mxu1 %v5662_v27  ;;  %5791 = vmatprep.subr.bf16.mxu0 %v5662_v27  ;;  %v6970_v4 = vld [vmem:[%s8824_s0 + $0x60] sm:$0xff]  ;;  %v6984_v8 = vld [vmem:[%s8824_s0 + $0x38] sm:$0xff]  ;;  %v6986_v9 = vpack.c.bf16 %v3493_v63, %v3492_v62  ;;  %v3494_v10 = vld [vmem:[%s8825_s1 + $0x190] sm:$0xff] }
  0x13   :  { %565 = vmatprep.mubr.f32.mxu0 %v6965_v3  ;;  %v3495_v11 = vld [vmem:[%s8825_s1 + $0x198] sm:$0xff] }
  0x15   :  { %5665 = vmatpush3.bf16.msra.mxu1 %v5664_v32  ;;  %5793 = vmatpush3.bf16.msra.mxu0 %v5664_v32 }
  0x16   :  { %5667 = vmatprep.subr.bf16.mxu1 %v5666_v33  ;;  %5795 = vmatprep.subr.bf16.mxu0 %v5666_v33 }
  0x19   :  { %5669 = vmatpush3.bf16.msra.mxu1 %v5668_v38  ;;  %5797 = vmatpush3.bf16.msra.mxu0 %v5668_v38 }
  0x1a   :  { %5671 = vmatprep.subr.bf16.mxu1 %v5670_v39  ;;  %5799 = vmatprep.subr.bf16.mxu0 %v5670_v39 }
  0x1d   :  { %5673 = vmatpush3.bf16.msra.mxu1 %v5672_v44  ;;  %5801 = vmatpush3.bf16.msra.mxu0 %v5672_v44 }
  0x1e   :  { %5675 = vmatprep.subr.bf16.mxu1 %v5674_v45  ;;  %5803 = vmatprep.subr.bf16.mxu0 %v5674_v45 }
  0x21   :  { %5677 = vmatpush3.bf16.msra.mxu1 %v5676_v50  ;;  %5805 = vmatpush3.bf16.msra.mxu0 %v5676_v50 }
  0x22   :  { %5679 = vmatprep.subr.bf16.mxu1 %v6912_v53  ;;  %5839 = vmatprep.subr.bf16.mxu0 %v6920_v56 }
  0x24   :  { %164 = vmatmul.mubr.f32.vlgmr.msra.gmra.mrb[0].mxu1 %v6925_v57  ;;  %566 = vmatmul.mubr.f32.vlgmr.msra.gmra.mrb[0].mxu0 %v6970_v4 }
  0x25   :  { %5681 = vmatpush3.bf16.msra.mxu1 %v6912_v53  ;;  %168 = vmatprep.mubr.f32.mxu1 %v6936_v60 }
  0x26   :  { %5683 = vmatprep.subr.bf16.mxu1 %v6928_v58 }
  0x27   :  { %16 = vsyncpa [#allocation5], 0  ;;  %v6997_v12 = vpack.c.bf16 %v3511_v2, %v3510_v1  ;;  %5841 = vmatpush3.bf16.msra.mxu0 %v6986_v9  ;;  %v7003_v13 = vld [vmem:[%s8824_s0 + $0x80] sm:$0xff]  ;;  %v7010_v14 = vld [vmem:[%s8824_s0 + $0x30] sm:$0xff]  ;;  %v7019_v17 = vpack.c.bf16 %v90_v7, %v89_v6  ;;  %v7029_v20 = vpack.c.bf16 %v3495_v11, %v3494_v10  ;;  %vm6735_vm0 = vmmov 0   ;;  %s6737_s23 = smov [#allocation4]  }
  0x28   :  { %169 = vmatmul.mubr.f32.gmra.mrb[2].mxu1 %v6952_v0  ;;  %v3512_v15 = vld [vmem:[%s8825_s1 + $0x220] sm:$0xff]  ;;  %v3513_v16 = vld [vmem:[%s8825_s1 + $0x228] sm:$0xff]  ;;  %v7027_v19 = vld [vmem:[%s8824_s0 + $0x50] sm:$0xff]  ;;  %570 = vmatprep.mubr.f32.mxu0 %v7003_v13  ;;  %vm3279_vm1 = vcmask 1040384   ;;  %s3484_s24 = sshll.u32 %s6737_s23, 4  ;;  %s3485_s24 = int_to_ptr.vmem [resolvable:$true] %s3484_s24 }
  0x29   :  { %5685 = vmatpush3.bf16.msra.mxu1 %v6928_v58  ;;  %173 = vmatprep.mubr.f32.mxu1 %v6984_v8  ;;  %v91_v18 = vld [vmem:[%s8825_s1 + $0x140] sm:$0xff]  ;;  %v92_v21 = vld [vmem:[%s8825_s1 + $0x148] sm:$0xff]  ;;  %v7043_v24 = vpack.c.bf16 %v3513_v16, %v3512_v15  ;;  %v7049_v26 = vld [vmem:[%s8824_s0 + $0x78] sm:$0xff]  ;;  %p6715_p1 = scmp.lt.s32.totalorder %s3485_s24, %s3485_s24 }
  0x2a   :  { %5687 = vmatprep.subr.bf16.mxu1 %v6973_v5  ;;  %5843 = vmatprep.subr.bf16.mxu0 %v6997_v12  ;;  %v3496_v22 = vld [vmem:[%s8825_s1 + $0x1a0] sm:$0xff]  ;;  %v3497_v23 = vld [vmem:[%s8825_s1 + $0x1a8] sm:$0xff]  ;;  %v3514_v28 = vld [vmem:[%s8825_s1 + $0x230] sm:$0xff]  ;;  %v7065_v30 = vpack.c.bf16 %v92_v21, %v91_v18 }
  0x2b   :  { %5845 = vmatpush3.bf16.msra.mxu0 %v7029_v20  ;;  %v7056_v27 = vld [vmem:[%s8824_s0 + $0x48] sm:$0xff]  ;;  %v3515_v29 = vld [vmem:[%s8825_s1 + $0x238] sm:$0xff]  ;;  %v93_v31 = vld [vmem:[%s8825_s1 + $0x150] sm:$0xff]  ;;  %v7075_v33 = vpack.c.bf16 %v3497_v23, %v3496_v22 }
  0x2c   :  { %174 = vmatmul.mubr.f32.gmra.mrb[4].mxu1 %v7010_v14  ;;  %v7073_v32 = vld [vmem:[%s8824_s0 + $0x10] sm:$0xff]  ;;  %5847 = vmatprep.subr.bf16.mxu0 %v7043_v24  ;;  %v94_v34 = vld [vmem:[%s8825_s1 + $0x158] sm:$0xff]  ;;  %v7089_v37 = vpack.c.bf16 %v3515_v29, %v3514_v28  ;;  %v3516_v38 = vld [vmem:[%s8825_s1 + $0x240] sm:$0xff] }
  0x2d   :  { %5689 = vmatpush3.bf16.msra.mxu1 %v6973_v5  ;;  %178 = vmatprep.mubr.f32.mxu1 %v7027_v19  ;;  %v3498_v35 = vld [vmem:[%s8825_s1 + $0x1b0] sm:$0xff]  ;;  %v3499_v36 = vld [vmem:[%s8825_s1 + $0x1b8] sm:$0xff]  ;;  %v3517_v39 = vld [vmem:[%s8825_s1 + $0x248] sm:$0xff]  ;;  %v7106_v41 = vpack.c.bf16 %v94_v34, %v93_v31 }
  0x2e   :  { %5691 = vmatprep.subr.bf16.mxu1 %v7019_v17  ;;  %571 = vmatmul.mubr.f32.gmra.mrb[2].mxu0 %v7049_v26  ;;  %v7101_v40 = vld [vmem:[%s8824_s0 + $0x98] sm:$0xff]  ;;  %v95_v42 = vld [vmem:[%s8825_s1 + $0x160] sm:$0xff]  ;;  %v96_v43 = vld [vmem:[%s8825_s1 + $0x168] sm:$0xff]  ;;  %v7114_v44 = vpack.c.bf16 %v3499_v36, %v3498_v35  ;;  %v7117_v45 = vpack.c.bf16 %v3517_v39, %v3516_v38 }
  0x2f   :  { %5849 = vmatpush3.bf16.msra.mxu0 %v7075_v33  ;;  %v3500_v46 = vld [vmem:[%s8825_s1 + $0x1c0] sm:$0xff]  ;;  %v3501_v47 = vld [vmem:[%s8825_s1 + $0x1c8] sm:$0xff]  ;;  %575 = vmatprep.mubr.f32.mxu0 %v7101_v40  ;;  %v7129_v48 = vld [vmem:[%s8824_s0 + $0x90] sm:$0xff]  ;;  %v7144_v52 = vpack.c.bf16 %v96_v43, %v95_v42 }
  0x30   :  { %179 = vmatmul.mubr.f32.gmra.mrb[6].mxu1 %v7056_v27  ;;  %5851 = vmatprep.subr.bf16.mxu0 %v7089_v37  ;;  %v3518_v49 = vld [vmem:[%s8825_s1 + $0x250] sm:$0xff]  ;;  %v3519_v50 = vld [vmem:[%s8825_s1 + $0x258] sm:$0xff]  ;;  %v5728_v59 = vpack.c.bf16 %v3501_v47, %v3500_v46  ;;  %v3549_v1 = vld [vmem:[%s8824_s0 + $0xa8] sm:$0xff] }
  0x31   :  { %5693 = vmatpush3.bf16.msra.mxu1 %v7019_v17  ;;  %4756 = vmatprep.mubr.f32.mxu1 %v7073_v32  ;;  %v3550_v51 = vld [vmem:[%s8824_s0 + $0xb0] sm:$0xff]  ;;  %v98_v55 = vld [vmem:[%s8825_s1 + $0x178] sm:$0xff]  ;;  %v5730_v61 = vpack.c.bf16 %v3519_v50, %v3518_v49  ;;  %v3520_v2 = vld [vmem:[%s8825_s1 + $0x260] sm:$0xff] }
  0x32   :  { %5695 = vmatprep.subr.bf16.mxu1 %v7065_v30  ;;  %v97_v54 = vld [vmem:[%s8825_s1 + $0x170] sm:$0xff]  ;;  %576 = vmatmul.mubr.f32.gmra.mrb[4].mxu0 %v7129_v48  ;;  %v3503_v63 = vld [vmem:[%s8825_s1 + $0x1d8] sm:$0xff]  ;;  %v3521_v6 = vld [vmem:[%s8825_s1 + $0x268] sm:$0xff] }
  0x33   :  { %5853 = vmatpush3.bf16.msra.mxu0 %v7114_v44  ;;  %v3502_v62 = vld [vmem:[%s8825_s1 + $0x1d0] sm:$0xff]  ;;  %580 = vmatprep.mubr.f32.mxu0 %v3550_v51  ;;  %v7170_v7 = vpack.c.bf16 %v98_v55, %v97_v54  ;;  %v5734_v11 = vpack.c.bf16 %v3521_v6, %v3520_v2  ;;  %v3504_v15 = vld [vmem:[%s8825_s1 + $0x1e0] sm:$0xff]  ;;  %v3505_v16 = vld [vmem:[%s8825_s1 + $0x1e8] sm:$0xff]  ;;  %v6734_v55 = vmov 0.0|0.0  }
  0x34   :  { %5855 = vmatprep.subr.bf16.mxu0 %v7117_v45  ;;  %v5732_v10 = vpack.c.bf16 %v3503_v63, %v3502_v62  ;;  %v3522_v18 = vld [vmem:[%s8825_s1 + $0x270] sm:$0xff]  ;;  %v3523_v21 = vld [vmem:[%s8825_s1 + $0x278] sm:$0xff]  ;;  %v5736_v22 = vpack.c.bf16 %v3505_v16, %v3504_v15  ;;  %v7197_v29 = vld [vmem:[%s8824_s0 + $0x28] sm:$0xff] }
  0x35   :  { %5697 = vmatpush3.bf16.msra.mxu1 %v7065_v30  ;;  %v5738_v23 = vpack.c.bf16 %v3523_v21, %v3522_v18  ;;  %v3507_v28 = vld [vmem:[%s8825_s1 + $0x1f8] sm:$0xff]  ;;  %v7203_v31 = vld [vmem:[%s8824_s0 + $0x40] sm:$0xff]  ;;  %v3537_v39 = vld [vmem:[%s8825_s1 + $0x2e8] sm:$0xff] }
  0x36   :  { %5699 = vmatprep.subr.bf16.mxu1 %v7106_v41  ;;  %581 = vmatmul.mubr.f32.gmra.mrb[6].mxu0 %v3549_v1  ;;  %v7211_v35 = vld [vmem:[%s8824_s0 + $0x58] sm:$0xff]  ;;  %v3542_v43 = vld [vmem:[%s8824_s0 + $0x70] sm:$0xff]  ;;  %v891_v50 = vld [vmem:[%s8827_s3 + $0x80] sm:$0xff] }
  0x37   :  { %5857 = vmatpush3.bf16.msra.mxu0 %v5728_v59  ;;  %735 = vmatprep.mubr.f32.mxu0 %v6965_v3  ;;  %v3506_v3 = vld [vmem:[%s8825_s1 + $0x1f0] sm:$0xff]  ;;  %v3531_v36 = vld [vmem:[%s8825_s1 + $0x2b8] sm:$0xff]  ;;  %v908_v62 = vld [vmem:[%s8827_s3 + $0x108] sm:$0xff] }
  0x38   :  { %5859 = vmatprep.subr.bf16.mxu0 %v5730_v61  ;;  %v5740_v34 = vpack.c.bf16 %v3507_v28, %v3506_v3  ;;  %v3535_v38 = vld [vmem:[%s8825_s1 + $0x2d8] sm:$0xff]  ;;  %v893_v6 = vld [vmem:[%s8827_s3 + $0x90] sm:$0xff]  ;;  %v895_v28 = vld [vmem:[%s8827_s3 + $0xa0] sm:$0xff] }
  0x39   :  { %5701 = vmatpush3.bf16.msra.mxu1 %v7106_v41  ;;  %v878_v16 = vld [vmem:[%s8827_s3 + $0x18] sm:$0xff]  ;;  %v909_v18 = vld [vmem:[%s8827_s3 + $0x110] sm:$0xff] }
  0x3a   :  { %5703 = vmatprep.subr.bf16.mxu1 %v7144_v52  ;;  %v910_v21 = vld [vmem:[%s8827_s3 + $0x118] sm:$0xff] }
  0x3b   :  { %5861 = vmatpush3.bf16.msra.mxu0 %v5732_v10  ;;  %v7390_v3 = vpack.c.bf16 %v910_v21, %v909_v18  ;;  %v886_v18 = vld [vmem:[%s8827_s3 + $0x58] sm:$0xff] }
  0x3c   :  { %5863 = vmatprep.subr.bf16.mxu0 %v5734_v11 }
  0x3d   :  { %5705 = vmatpush3.bf16.msra.mxu1 %v7144_v52 }
  0x3e   :  { %5707 = vmatprep.subr.bf16.mxu1 %v7170_v7 }
  0x3f   :  { %5865 = vmatpush3.bf16.msra.mxu0 %v5736_v22 }
  0x40   :  { %5867 = vmatprep.subr.bf16.mxu0 %v5738_v23 }
  0x41   :  { %5709 = vmatpush3.bf16.msra.mxu1 %v7170_v7 }
  0x42   :  { %5711 = vmatprep.subr.bf16.mxu1 %v6920_v56  ;;  %v3525_v56 = vld [vmem:[%s8825_s1 + $0x288] sm:$0xff] }
  0x43   :  { %5869 = vmatpush3.bf16.msra.mxu0 %v5740_v34 }
  0x44   :  { %4757 = vmatmul.mubr.f32.vlgmr.msra.gmra.mrb[8].mxu1 %v7197_v29 }
  0x45   :  { %5713 = vmatpush3.bf16.msra.mxu1 %v6986_v9  ;;  %4759 = vmatprep.mubr.f32.mxu1 %v7203_v31  ;;  %v3526_v9 = vld [vmem:[%s8825_s1 + $0x290] sm:$0xff] }
  0x46   :  { %5715 = vmatprep.subr.bf16.mxu1 %v6997_v12  ;;  %736 = vmatmul.mubr.f32.vlgmr.msra.gmra.mrb[8].mxu0 %v6970_v4  ;;  %v3527_v12 = vld [vmem:[%s8825_s1 + $0x298] sm:$0xff] }
  0x47   :  { %740 = vmatprep.mubr.f32.mxu0 %v7003_v13  ;;  %v7242_v13 = vpack.c.bf16 %v3527_v12, %v3526_v9 }
  0x48   :  { %4760 = vmatmul.mubr.f32.gmra.mrb[10].mxu1 %v7211_v35 }
  0x49   :  { %5717 = vmatpush3.bf16.msra.mxu1 %v7029_v20  ;;  %382 = vmatprep.mubr.f32.mxu1 %v6855_v25  ;;  %v3524_v25 = vld [vmem:[%s8825_s1 + $0x280] sm:$0xff] }
  0x4a   :  { %5719 = vmatprep.subr.bf16.mxu1 %v7043_v24  ;;  %741 = vmatmul.mubr.f32.gmra.mrb[10].mxu0 %v7049_v26  ;;  %v7233_v4 = vpack.c.bf16 %v3525_v56, %v3524_v25  ;;  %v3528_v20 = vld [vmem:[%s8825_s1 + $0x2a0] sm:$0xff]  ;;  %v3529_v24 = vld [vmem:[%s8825_s1 + $0x2a8] sm:$0xff] }
  0x4b   :  { %745 = vmatprep.mubr.f32.mxu0 %v7101_v40  ;;  %v7254_v26 = vpack.c.bf16 %v3529_v24, %v3528_v20  ;;  %v880_v25 = vld [vmem:[%s8827_s3 + $0x28] sm:$0xff]  ;;  %v911_v56 = vld [vmem:[%s8827_s3 + $0x120] sm:$0xff]  ;;  %v898_v20 = vld [vmem:[%s8827_s3 + $0xb8] sm:$0xff] }
  0x4d   :  { %5721 = vmatpush3.bf16.msra.mxu1 %v7075_v33  ;;  %v3530_v33 = vld [vmem:[%s8825_s1 + $0x2b0] sm:$0xff] }
  0x4e   :  { %5723 = vmatprep.subr.bf16.mxu1 %v7089_v37  ;;  %746 = vmatmul.mubr.f32.gmra.mrb[12].mxu0 %v7129_v48  ;;  %v3533_v37 = vld [vmem:[%s8825_s1 + $0x2c8] sm:$0xff] }
  0x4f   :  { %750 = vmatprep.mubr.f32.mxu0 %v3550_v51  ;;  %v892_v51 = vld [vmem:[%s8827_s3 + $0x88] sm:$0xff] }
  0x50   :  { %v7347_v54 = vpack.c.bf16 %v892_v51, %v891_v50  ;;  %v916_v51 = vld [vmem:[%s8827_s3 + $0x148] sm:$0xff] }
  0x51   :  { %5725 = vmatpush3.bf16.msra.mxu1 %v7114_v44 }
  0x52   :  { %5727 = vmatprep.subr.bf16.mxu1 %v7117_v45  ;;  %751 = vmatmul.mubr.f32.gmra.mrb[14].mxu0 %v3549_v1 }
  0x53   :  { %5903 = vmatprep.subr.bf16.mxu0 %v7347_v54 }
  0x55   :  { %5729 = vmatpush3.bf16.msra.mxu1 %v5728_v59  ;;  %v876_v59 = vld [vmem:[%s8827_s3 + $0x8] sm:$0xff] }
  0x56   :  { %5731 = vmatprep.subr.bf16.mxu1 %v5730_v61  ;;  %v907_v61 = vld [vmem:[%s8827_s3 + $0x100] sm:$0xff] }
  0x57   :  { %v7361_v2 = vpack.c.bf16 %v908_v62, %v907_v61 }
  0x59   :  { %5733 = vmatpush3.bf16.msra.mxu1 %v5732_v10  ;;  %v877_v10 = vld [vmem:[%s8827_s3 + $0x10] sm:$0xff] }
  0x5a   :  { %5735 = vmatprep.subr.bf16.mxu1 %v5734_v11 }
  0x5d   :  { %5737 = vmatpush3.bf16.msra.mxu1 %v5736_v22 }
  0x5e   :  { %5739 = vmatprep.subr.bf16.mxu1 %v5738_v23  ;;  %v7388_v23 = vpack.c.bf16 %v878_v16, %v877_v10  ;;  %v885_v16 = vld [vmem:[%s8827_s3 + $0x50] sm:$0xff] }
  0x61   :  { %5741 = vmatpush3.bf16.msra.mxu1 %v5740_v34 }
  0x62   :  { %5743 = vmatprep.subr.bf16.mxu1 %v7233_v4 }
  0x64   :  { %383 = vmatmul.mubr.f32.vlgmr.msra.gmra.mrb[12].mxu1 %v6925_v57  ;;  %v5754_v57 = vpack.c.bf16 %v3531_v36, %v3530_v33 }
  0x65   :  { %5745 = vmatpush3.bf16.msra.mxu1 %v7233_v4  ;;  %387 = vmatprep.mubr.f32.mxu1 %v6936_v60  ;;  %v3532_v60 = vld [vmem:[%s8825_s1 + $0x2c0] sm:$0xff] }
  0x66   :  { %5747 = vmatprep.subr.bf16.mxu1 %v7242_v13 }
  0x68   :  { %388 = vmatmul.mubr.f32.gmra.mrb[14].mxu1 %v6952_v0  ;;  %v5758_v0 = vpack.c.bf16 %v3533_v37, %v3532_v60 }
  0x69   :  { %5749 = vmatpush3.bf16.msra.mxu1 %v7242_v13  ;;  %392 = vmatprep.mubr.f32.mxu1 %v6984_v8  ;;  %v3534_v8 = vld [vmem:[%s8825_s1 + $0x2d0] sm:$0xff] }
  0x6a   :  { %5751 = vmatprep.subr.bf16.mxu1 %v7254_v26 }
  0x6c   :  { %393 = vmatmul.mubr.f32.gmra.mrb[16].mxu1 %v7010_v14  ;;  %v5762_v14 = vpack.c.bf16 %v3535_v38, %v3534_v8 }
  0x6d   :  { %5753 = vmatpush3.bf16.msra.mxu1 %v7254_v26  ;;  %397 = vmatprep.mubr.f32.mxu1 %v7027_v19  ;;  %v3536_v19 = vld [vmem:[%s8825_s1 + $0x2e0] sm:$0xff] }
  0x6e   :  { %5755 = vmatprep.subr.bf16.mxu1 %v5754_v57  ;;  %v5766_v40 = vpack.c.bf16 %v3537_v39, %v3536_v19  ;;  %v881_v39 = vld [vmem:[%s8827_s3 + $0x30] sm:$0xff] }
  0x70   :  { %398 = vmatmul.mubr.f32.gmra.mrb[18].mxu1 %v7056_v27  ;;  %v3538_v27 = vld [vmem:[%s8825_s1 + $0x2f0] sm:$0xff] }
  0x71   :  { %5757 = vmatpush3.bf16.msra.mxu1 %v5754_v57  ;;  %4794 = vmatprep.mubr.f32.mxu1 %v7073_v32  ;;  %v3539_v32 = vld [vmem:[%s8825_s1 + $0x2f8] sm:$0xff] }
  0x72   :  { %5759 = vmatprep.subr.bf16.mxu1 %v5758_v0  ;;  %v5770_v42 = vpack.c.bf16 %v3539_v32, %v3538_v27  ;;  %v913_v27 = vld [vmem:[%s8827_s3 + $0x130] sm:$0xff] }
  0x75   :  { %5761 = vmatpush3.bf16.msra.mxu1 %v5758_v0 }
  0x76   :  { %5763 = vmatprep.subr.bf16.mxu1 %v5762_v14 }
  0x79   :  { %5765 = vmatpush3.bf16.msra.mxu1 %v5762_v14 }
  0x7a   :  { %5767 = vmatprep.subr.bf16.mxu1 %v5766_v40 }
  0x7d   :  { %5769 = vmatpush3.bf16.msra.mxu1 %v5766_v40 }
  0x7e   :  { %5771 = vmatprep.subr.bf16.mxu1 %v5770_v42 }
  0x81   :  { %5773 = vmatpush3.bf16.msra.mxu1 %v5770_v42 }
  0x82   :  { %5807 = vmatprep.subr.bf16.mxu1 %v6912_v53 }
  0x84   :  { %4795 = vmatmul.mubr.f32.vlgmr.msra.gmra.mrb[20].mxu1 %v7197_v29  ;;  %v896_v29 = vld [vmem:[%s8827_s3 + $0xa8] sm:$0xff] }
  0x85   :  { %5809 = vmatpush3.bf16.msra.mxu1 %v6912_v53  ;;  %4797 = vmatprep.mubr.f32.mxu1 %v7203_v31  ;;  %v3545_v53 = vld [vmem:[%s8824_s0 + $0x88] sm:$0xff]  ;;  %v879_v31 = vld [vmem:[%s8827_s3 + $0x20] sm:$0xff] }
  0x86   :  { %5811 = vmatprep.subr.bf16.mxu1 %v6928_v58  ;;  %v7424_v36 = vpack.c.bf16 %v880_v25, %v879_v31  ;;  %v918_v31 = vld [vmem:[%s8827_s3 + $0x158] sm:$0xff] }
  0x88   :  { %4798 = vmatmul.mubr.f32.gmra.mrb[22].mxu1 %v7211_v35  ;;  %v7403_v35 = vpack.c.bf16 %v896_v29, %v895_v28  ;;  %v7514_v28 = vpack.c.bf16 %v886_v18, %v885_v16  ;;  %v917_v29 = vld [vmem:[%s8827_s3 + $0x150] sm:$0xff] }
  0x89   :  { %5813 = vmatpush3.bf16.msra.mxu1 %v6928_v58  ;;  %4832 = vmatprep.mubr.f32.mxu1 %v3542_v43  ;;  %v3548_v58 = vld [vmem:[%s8824_s0 + $0xa0] sm:$0xff]  ;;  %v7523_v25 = vpack.c.bf16 %v918_v31, %v917_v29 }
  0x8a   :  { %5815 = vmatprep.subr.bf16.mxu1 %v6973_v5 }
  0x8d   :  { %5817 = vmatpush3.bf16.msra.mxu1 %v6973_v5  ;;  %v3551_v5 = vld [vmem:[%s8824_s0 + $0xb8] sm:$0xff] }
  0x8e   :  { %5819 = vmatprep.subr.bf16.mxu1 %v7019_v17 }
  0x91   :  { %5821 = vmatpush3.bf16.msra.mxu1 %v7019_v17 }
  0x92   :  { %5823 = vmatprep.subr.bf16.mxu1 %v7065_v30 }
  0x95   :  { %5825 = vmatpush3.bf16.msra.mxu1 %v7065_v30 }
  0x96   :  { %5827 = vmatprep.subr.bf16.mxu1 %v7106_v41 }
  0x99   :  { %5829 = vmatpush3.bf16.msra.mxu1 %v7106_v41 }
  0x9a   :  { %5831 = vmatprep.subr.bf16.mxu1 %v7144_v52 }
  0x9d   :  { %5833 = vmatpush3.bf16.msra.mxu1 %v7144_v52  ;;  %v875_v52 = vld [vmem:[%s8827_s3] sm:$0xff] }
  0x9e   :  { %5835 = vmatprep.subr.bf16.mxu1 %v7170_v7  ;;  %v7359_v1 = vpack.c.bf16 %v876_v59, %v875_v52 }
  0xa0   :  { %5905 = vmatpush3.bf16.msra.mxu0 %v7359_v1 }
  0xa1   :  { %5837 = vmatpush3.bf16.msra.mxu1 %v7170_v7  ;;  %v894_v7 = vld [vmem:[%s8827_s3 + $0x98] sm:$0xff] }
  0xa2   :  { %5871 = vmatprep.subr.bf16.mxu1 %v7233_v4  ;;  %v7373_v15 = vpack.c.bf16 %v894_v7, %v893_v6 }
  0xa4   :  { %4833 = vmatmul.mubr.f32.vlgmr.msra.gmra.mrb[24].mxu1 %v3545_v53  ;;  %5907 = vmatprep.subr.bf16.mxu0 %v7373_v15 }
  0xa5   :  { %5873 = vmatpush3.bf16.msra.mxu1 %v7233_v4  ;;  %4835 = vmatprep.mubr.f32.mxu1 %v3548_v58  ;;  %v912_v4 = vld [vmem:[%s8827_s3 + $0x128] sm:$0xff] }
  0xa6   :  { %5875 = vmatprep.subr.bf16.mxu1 %v7242_v13  ;;  %5909 = vmatpush3.bf16.msra.mxu0 %v7388_v23 }
  0xa7   :  { %5911 = vmatprep.subr.bf16.mxu0 %v7403_v35 }
  0xa8   :  { %4836 = vmatmul.mubr.f32.gmra.mrb[26].mxu1 %v3551_v5 }
  0xa9   :  { %5877 = vmatpush3.bf16.msra.mxu1 %v7242_v13  ;;  %4870 = vmatprep.mubr.f32.mxu1 %v3542_v43  ;;  %v897_v13 = vld [vmem:[%s8827_s3 + $0xb0] sm:$0xff] }
  0xaa   :  { %5879 = vmatprep.subr.bf16.mxu1 %v7254_v26  ;;  %v7430_v60 = vpack.c.bf16 %v898_v20, %v897_v13  ;;  %5913 = vmatpush3.bf16.msra.mxu0 %v7424_v36  ;;  %v887_v13 = vld [vmem:[%s8827_s3 + $0x60] sm:$0xff]  ;;  %v888_v20 = vld [vmem:[%s8827_s3 + $0x68] sm:$0xff] }
  0xac   :  { %5915 = vmatprep.subr.bf16.mxu0 %v7430_v60 }
  0xad   :  { %5881 = vmatpush3.bf16.msra.mxu1 %v7254_v26 }
  0xae   :  { %5883 = vmatprep.subr.bf16.mxu1 %v5754_v57 }
  0xb1   :  { %5885 = vmatpush3.bf16.msra.mxu1 %v5754_v57  ;;  %v7426_v57 = vpack.c.bf16 %v912_v4, %v911_v56  ;;  %v904_v4 = vld [vmem:[%s8827_s3 + $0xe8] sm:$0xff] }
  0xb2   :  { %5887 = vmatprep.subr.bf16.mxu1 %v5758_v0 }
  0xb5   :  { %5889 = vmatpush3.bf16.msra.mxu1 %v5758_v0 }
  0xb6   :  { %5891 = vmatprep.subr.bf16.mxu1 %v5762_v14 }
  0xb9   :  { %5893 = vmatpush3.bf16.msra.mxu1 %v5762_v14 }
  0xba   :  { %5895 = vmatprep.subr.bf16.mxu1 %v5766_v40 }
  0xbd   :  { %5897 = vmatpush3.bf16.msra.mxu1 %v5766_v40  ;;  %v882_v40 = vld [vmem:[%s8827_s3 + $0x38] sm:$0xff] }
  0xbe   :  { %5899 = vmatprep.subr.bf16.mxu1 %v5770_v42  ;;  %v7449_v32 = vpack.c.bf16 %v882_v40, %v881_v39  ;;  %v905_v39 = vld [vmem:[%s8827_s3 + $0xf0] sm:$0xff]  ;;  %v906_v40 = vld [vmem:[%s8827_s3 + $0xf8] sm:$0xff] }
  0xc0   :  { %5917 = vmatpush3.bf16.msra.mxu0 %v7449_v32 }
  0xc1   :  { %5901 = vmatpush3.bf16.msra.mxu1 %v5770_v42  ;;  %v914_v42 = vld [vmem:[%s8827_s3 + $0x138] sm:$0xff] }
  0xc2   :  { %5934 = vmatprep.subr.bf16.mxu1 %v6734_v55  ;;  %v7454_v43 = vpack.c.bf16 %v914_v42, %v913_v27  ;;  %v7565_v42 = vpack.c.bf16 %v906_v40, %v905_v39 }
  0xc4   :  { %4871 = vmatmul.mubr.f32.vlgmr.msra.gmra.mrb[28].mxu1 %v3545_v53 }
  0xc5   :  { %4873 = vmatprep.mubr.f32.mxu1 %v3548_v58  ;;  %5936 = vmatpush3.bf16.msra.mxu1 %v7361_v2  ;;  %v899_v58 = vld [vmem:[%s8827_s3 + $0xc0] sm:$0xff] }
  0xc6   :  { %5937 = vmatprep.subr.bf16.mxu1 %v6734_v55 }
  0xc8   :  { %4874 = vmatmul.mubr.f32.gmra.mrb[30].mxu1 %v3551_v5  ;;  %v900_v5 = vld [vmem:[%s8827_s3 + $0xc8] sm:$0xff] }
  0xc9   :  { %5939 = vmatpush3.bf16.msra.mxu1 %v7390_v3 }
  0xca   :  { %5940 = vmatprep.subr.bf16.mxu1 %v6734_v55 }
  0xcd   :  { %5942 = vmatpush3.bf16.msra.mxu1 %v7426_v57 }
  0xce   :  { %5943 = vmatprep.subr.bf16.mxu1 %v6734_v55 }
  0xd1   :  { %5945 = vmatpush3.bf16.msra.mxu1 %v7454_v43 }
  0xd2   :  { %5946 = vmatprep.subr.bf16.mxu1 %v6734_v55 }
  0xf7   :  { %v3846_v17 = vpop.f32.mrb[0].mxu1  ;;  %v3974_v44 = vpop.f32.mrb[0].mxu0 }
  0xf8   :  { %v3847_v30 = vpop.f32.mrb[1].mxu1  ;;  %v3975_v46 = vpop.f32.mrb[1].mxu0 }
  0xf9   :  { %v7332_v41 = vadd.f32 %v3847_v30, %v3846_v17  ;;  %v7334_v48 = vadd.f32 %v3975_v46, %v3974_v44  ;;  %v7467_v44 = vpack.c.bf16 %v900_v5, %v899_v58  ;;  %v884_v46 = vld [vmem:[%s8827_s3 + $0x48] sm:$0xff]  ;;  %v890_v58 = vld [vmem:[%s8827_s3 + $0x78] sm:$0xff]  ;;  %v921_v5 = vld [vmem:[%s8827_s3 + $0x170] sm:$0xff] }
  0xfb   :  { %v3849_v45 = vpop.f32.mrb[2].mxu1  ;;  %5919 = vmatprep.subr.bf16.mxu0 %v7467_v44 }
  0xfc   :  { %v3850_v47 = vpop.f32.mrb[3].mxu1 }
  0xfd   :  { %v7336_v49 = vadd.f32 %v3850_v47, %v3849_v45  ;;  %v883_v45 = vld [vmem:[%s8827_s3 + $0x40] sm:$0xff] }
  0xfe   :  { %v915_v47 = vld [vmem:[%s8827_s3 + $0x140] sm:$0xff]  ;;  %v7482_v50 = vpack.c.bf16 %v884_v46, %v883_v45  ;;  %v922_v45 = vld [vmem:[%s8827_s3 + $0x178] sm:$0xff] }
  0xff   :  { %v3852_v63 = vpop.f32.mrb[4].mxu1  ;;  %v7488_v59 = vpack.c.bf16 %v916_v51, %v915_v47  ;;  %v7583_v47 = vpack.c.bf16 %v922_v45, %v921_v5 }
 0x100   :  { %v3853_v11 = vpop.f32.mrb[5].mxu1  ;;  %5921 = vmatpush3.bf16.msra.mxu0 %v7482_v50 }
 0x101   :  { %v7384_v22 = vadd.f32 %v3853_v11, %v3852_v63  ;;  %v3977_v34 = vpop.f32.mrb[2].mxu0  ;;  %v902_v63 = vld [vmem:[%s8827_s3 + $0xd8] sm:$0xff]  ;;  %5948 = vmatpush3.bf16.msra.mxu1 %v7488_v59 }
 0x102   :  { %v3978_v12 = vpop.f32.mrb[3].mxu0  ;;  %5949 = vmatprep.subr.bf16.mxu1 %v6734_v55 }
 0x103   :  { %v3855_v9 = vpop.f32.mrb[6].mxu1  ;;  %v7420_v26 = vadd.f32 %v3978_v12, %v3977_v34 }
 0x104   :  { %v3856_v24 = vpop.f32.mrb[7].mxu1 }
 0x105   :  { %v3857_v33 = vadd.f32 %v3856_v24, %v3855_v9  ;;  %v3980_v37 = vpop.f32.mrb[4].mxu0  ;;  %5951 = vmatpush3.bf16.msra.mxu1 %v7523_v25  ;;  %v919_v24 = vld [vmem:[%s8827_s3 + $0x160] sm:$0xff] }
 0x106   :  { %v3981_v0 = vpop.f32.mrb[5].mxu0  ;;  %5952 = vmatprep.subr.bf16.mxu1 %v6734_v55 }
 0x107   :  { %v7436_v8 = vadd.f32 %v3981_v0, %v3980_v37  ;;  %v920_v37 = vld [vmem:[%s8827_s3 + $0x168] sm:$0xff] }
 0x109   :  { %v3983_v38 = vpop.f32.mrb[6].mxu0 }
 0x10a   :  { %v3984_v14 = vpop.f32.mrb[7].mxu0 }
 0x10b   :  { %v7438_v19 = vadd.f32 %v3984_v14, %v3983_v38  ;;  %v7553_v38 = vpack.c.bf16 %v920_v37, %v919_v24 }
 0x10d   :  { %5954 = vmatpush3.bf16.msra.mxu1 %v7553_v38 }
 0x10e   :  { %5955 = vmatprep.subr.bf16.mxu1 %v6734_v55 }
 0x111   :  { %5957 = vmatpush3.bf16.msra.mxu1 %v7583_v47 }
 0x112   :  { %5990 = vmatprep.subr.bf16.mxu1 %v6734_v55 }
 0x117   :  { %v4758_v53 = vpop.f32.mrb[8].mxu1 }
 0x118   :  { %v7464_v17 = vadd.f32 %v4758_v53, %v7336_v49  ;;  %v250_v30 = vpop.f32.mrb[9].mxu1  ;;  %v889_v53 = vld [vmem:[%s8827_s3 + $0x70] sm:$0xff] }
 0x119   :  { %v7479_v49 = vadd.f32 %v7332_v41, %v250_v30  ;;  %v4038_v52 = vpop.f32.mrb[8].mxu0  ;;  %v901_v41 = vld [vmem:[%s8827_s3 + $0xd0] sm:$0xff]  ;;  %v7577_v30 = vpack.c.bf16 %v890_v58, %v889_v53 }
 0x11a   :  { %v4039_v62 = vpop.f32.mrb[9].mxu0  ;;  %v7502_v11 = vpack.c.bf16 %v902_v63, %v901_v41  ;;  %v8836_v63 = vmov 0.0  }
 0x11b   :  { %v4761_v61 = vpop.f32.mrb[10].mxu1  ;;  %v7499_v10 = vadd.f32 %v4039_v62, %v4038_v52  ;;  %v3569_v52 = vld [vmem:[%s8827_s3 + $0x200] sm:$0xff]  ;;  %4908 = vmatprep.mubr.msk.f32.mxu1 %vm6735_vm0, %v8836_v63 }
 0x11c   :  { %v7497_v6 = vadd.f32 %v4761_v61, %v3857_v33  ;;  %v260_v7 = vpop.f32.mrb[11].mxu1  ;;  %5923 = vmatprep.subr.bf16.mxu0 %v7502_v11  ;;  %v7547_v33 = vpack.c.bf16 %v888_v20, %v887_v13  ;;  %v3570_v61 = vld [vmem:[%s8827_s3 + $0x208] sm:$0xff] }
 0x11d   :  { %v7511_v21 = vadd.f32 %v7384_v22, %v260_v7  ;;  %v4041_v34 = vpop.f32.mrb[10].mxu0  ;;  %5925 = vmatpush3.bf16.msra.mxu0 %v7514_v28  ;;  %v903_v22 = vld [vmem:[%s8827_s3 + $0xe0] sm:$0xff]  ;;  %v7593_v41 = vpack.c.bf16 %v3570_v61, %v3569_v52 }
 0x11e   :  { %v4042_v56 = vpop.f32.mrb[11].mxu0  ;;  %v7535_v12 = vpack.c.bf16 %v904_v4, %v903_v22 }
 0x11f   :  { %v7532_v9 = vadd.f32 %v4042_v56, %v4041_v34 }
 0x120   :  { %5927 = vmatprep.subr.bf16.mxu0 %v7535_v12 }
 0x121   :  { %v4044_v0 = vpop.f32.mrb[12].mxu0  ;;  %5929 = vmatpush3.bf16.msra.mxu0 %v7547_v33 }
 0x122   :  { %v4045_v14 = vpop.f32.mrb[13].mxu0  ;;  %5931 = vmatprep.subr.bf16.mxu0 %v7565_v42 }
 0x123   :  { %v7562_v27 = vadd.f32 %v4045_v14, %v4044_v0 }
 0x125   :  { %v4047_v46 = vpop.f32.mrb[14].mxu0  ;;  %5933 = vmatpush3.bf16.msra.mxu0 %v7577_v30 }
 0x126   :  { %v4048_v51 = vpop.f32.mrb[15].mxu0  ;;  %5959 = vmatprep.subr.bf16.mxu0 %v7593_v41 }
 0x127   :  { %v4049_v62 = vadd.f32 %v4048_v51, %v4047_v46 }
 0x137   :  { %v3910_v7 = vpop.f32.mrb[12].mxu1 }
 0x138   :  { %v3911_v16 = vpop.f32.mrb[13].mxu1 }
 0x139   :  { %v3912_v18 = vadd.f32 %v3911_v16, %v3910_v7 }
 0x13b   :  { %v3913_v29 = vpop.f32.mrb[14].mxu1 }
 0x13c   :  { %v3914_v31 = vpop.f32.mrb[15].mxu1 }
 0x13d   :  { %v3915_v34 = vadd.f32 %v3914_v31, %v3913_v29 }
 0x13f   :  { %v3916_v56 = vpop.f32.mrb[16].mxu1 }
 0x140   :  { %v3917_v22 = vpop.f32.mrb[17].mxu1 }
 0x141   :  { %v3918_v4 = vadd.f32 %v3917_v22, %v3916_v56 }
 0x143   :  { %v3919_v13 = vpop.f32.mrb[18].mxu1 }
 0x144   :  { %v3920_v20 = vpop.f32.mrb[19].mxu1 }
 0x145   :  { %v3921_v24 = vadd.f32 %v3920_v20, %v3919_v13 }
 0x157   :  { %v4796_v37 = vpop.f32.mrb[20].mxu1 }
 0x158   :  { %v475_v0 = vadd.f32 %v4796_v37, %v3915_v34  ;;  %v469_v14 = vpop.f32.mrb[21].mxu1 }
 0x159   :  { %v470_v39 = vadd.f32 %v3912_v18, %v469_v14 }
 0x15a   :  { %v842_v40 = vmax.f32 %v7464_v17, %v475_v0 }
 0x15b   :  { %v841_v53 = vmax.f32 %v7479_v49, %v470_v39  ;;  %v4799_v58 = vpop.f32.mrb[22].mxu1 }
 0x15c   :  { %v485_v5 = vadd.f32 %v4799_v58, %v3921_v24  ;;  %v479_v45 = vpop.f32.mrb[23].mxu1 }
 0x15d   :  { %v480_v46 = vadd.f32 %v3918_v4, %v479_v45 }
 0x15e   :  { %v844_v51 = vmax.f32 %v7497_v6, %v485_v5 }
 0x15f   :  { %v843_v52 = vmax.f32 %v7511_v21, %v480_v46 }
 0x177   :  { %v4834_v61 = vpop.f32.mrb[24].mxu1 }
 0x178   :  { %v658_v7 = vadd.f32 %v4834_v61, %v7420_v26  ;;  %v652_v16 = vpop.f32.mrb[25].mxu1  ;;  %v3552_v26 = vld [vmem:[%s8826_s2] ss:$0 sm:$0xff] }
 0x179   :  { %v653_v29 = vadd.f32 %v7334_v48, %v652_v16 }
 0x17b   :  { %v4837_v31 = vpop.f32.mrb[26].mxu1 }
 0x17c   :  { %v662_v18 = vpop.f32.mrb[27].mxu1  ;;  %v668_v17 = vadd.f32 %v4837_v31, %v7438_v19  ;;  %v3555_v31 = vld [vmem:[%s8827_s3 + $0x190] sm:$0xff] }
 0x17d   :  { %v663_v49 = vadd.f32 %v7436_v8, %v662_v18  ;;  %v3556_v18 = vld [vmem:[%s8827_s3 + $0x198] sm:$0xff] }
 0x197   :  { %v4872_v34 = vpop.f32.mrb[28].mxu1 }
 0x198   :  { %v828_v56 = vadd.f32 %v4872_v34, %v7532_v9  ;;  %v822_v22 = vpop.f32.mrb[29].mxu1 }
 0x199   :  { %v823_v6 = vadd.f32 %v7499_v10, %v822_v22  ;;  %v3573_v22 = vld [vmem:[%s8827_s3 + $0x220] sm:$0xff] }
 0x19a   :  { %v846_v4 = vmax.f32 %v658_v7, %v828_v56  ;;  %v3572_v7 = vld [vmem:[%s8827_s3 + $0x218] sm:$0xff] }
 0x19b   :  { %v845_v21 = vmax.f32 %v653_v29, %v823_v6  ;;  %v4875_v13 = vpop.f32.mrb[30].mxu1  ;;  %v3588_v56 = vld [vmem:[%s8827_s3 + $0x298] sm:$0xff] }
 0x19c   :  { %v850_v48 = vmax.f32 %v842_v40, %v846_v4  ;;  %v838_v20 = vadd.f32 %v4875_v13, %v4049_v62  ;;  %v832_v24 = vpop.f32.mrb[31].mxu1  ;;  %v3553_v62 = vld [vmem:[%s8827_s3 + $0x180] sm:$0xff] }
 0x19d   :  { %v849_v37 = vmax.f32 %v841_v53, %v845_v21  ;;  %v833_v19 = vadd.f32 %v7562_v27, %v832_v24  ;;  %v3554_v27 = vld [vmem:[%s8827_s3 + $0x188] sm:$0xff]  ;;  %v3585_v53 = vld [vmem:[%s8827_s3 + $0x280] sm:$0xff]  ;;  %v7666_v21 = vpack.c.bf16 %v3556_v18, %v3555_v31  ;;  %v3579_v31 = vld [vmem:[%s8827_s3 + $0x250] sm:$0xff] }
 0x19e   :  { %v861_v8 = vadd.f32 %v3552_v26, %v850_v48  ;;  %v848_v0 = vmax.f32 %v668_v17, %v838_v20  ;;  %v7631_v16 = vpack.c.bf16 %v3554_v27, %v3553_v62  ;;  %v3587_v17 = vld [vmem:[%s8827_s3 + $0x290] sm:$0xff]  ;;  %v3557_v48 = vld [vmem:[%s8827_s3 + $0x1a0] sm:$0xff]  ;;  %v3558_v24 = vld [vmem:[%s8827_s3 + $0x1a8] sm:$0xff] }
 0x19f   :  { %v860_v14 = vadd.f32 %v3552_v26, %v849_v37  ;;  %v847_v9 = vmax.f32 %v663_v49, %v833_v19  ;;  %v7668_v13 = vpack.c.bf16 %v3588_v56, %v3587_v17  ;;  %v3589_v37 = vld [vmem:[%s8827_s3 + $0x2a0] sm:$0xff]  ;;  %v3590_v19 = vld [vmem:[%s8827_s3 + $0x2a8] sm:$0xff]  ;;  %v3580_v18 = vld [vmem:[%s8827_s3 + $0x258] sm:$0xff] }
 0x1a0   :  { %v865_v39 = vmax.f32 %v861_v8, 0.0  ;;  %v852_v58 = vmax.f32 %v844_v51, %v848_v0  ;;  %v3586_v51 = vld [vmem:[%s8827_s3 + $0x288] sm:$0xff]  ;;  %v3575_v8 = vld [vmem:[%s8827_s3 + $0x230] sm:$0xff]  ;;  %v3576_v0 = vld [vmem:[%s8827_s3 + $0x238] sm:$0xff] }
 0x1a1   :  { %v864_v10 = vmax.f32 %v860_v14, 0.0  ;;  %v851_v5 = vmax.f32 %v843_v52, %v847_v9  ;;  %v3571_v52 = vld [vmem:[%s8827_s3 + $0x210] sm:$0xff]  ;;  %v7633_v29 = vpack.c.bf16 %v3586_v51, %v3585_v53  ;;  %v7697_v14 = vpack.c.bf16 %v3558_v24, %v3557_v48  ;;  %v3561_v27 = vld [vmem:[%s8827_s3 + $0x1c0] sm:$0xff]  ;;  %v3562_v51 = vld [vmem:[%s8827_s3 + $0x1c8] sm:$0xff] }
 0x1a2   :  { %869 = vst [vmem:[#allocation2 + $0x8] sm:$0xff] %v865_v39  ;;  %v863_v45 = vadd.f32 %v3552_v26, %v852_v58  ;;  %v7646_v34 = vpack.c.bf16 %v3572_v7, %v3571_v52  ;;  %v7699_v9 = vpack.c.bf16 %v3590_v19, %v3589_v37  ;;  %v3559_v39 = vld [vmem:[%s8827_s3 + $0x1b0] sm:$0xff]  ;;  %v7706_v58 = vpack.c.bf16 %v3576_v0, %v3575_v8  ;;  %v3593_v52 = vld [vmem:[%s8827_s3 + $0x2c0] sm:$0xff]  ;;  %v3594_v7 = vld [vmem:[%s8827_s3 + $0x2c8] sm:$0xff] }
 0x1a3   :  { %868 = vst [vmem:[#allocation2] sm:$0xff] %v864_v10  ;;  %v862_v46 = vadd.f32 %v3552_v26, %v851_v5  ;;  %v3574_v26 = vld [vmem:[%s8827_s3 + $0x228] sm:$0xff]  ;;  %v3560_v10 = vld [vmem:[%s8827_s3 + $0x1b8] sm:$0xff]  ;;  %v3591_v5 = vld [vmem:[%s8827_s3 + $0x2b0] sm:$0xff]  ;;  %v7753_v17 = vpack.c.bf16 %v3562_v51, %v3561_v27  ;;  %v7755_v56 = vpack.c.bf16 %v3594_v7, %v3593_v52 }
 0x1a4   :  { %v867_v61 = vmax.f32 %v863_v45, 0.0  ;;  %v7675_v20 = vpack.c.bf16 %v3574_v26, %v3573_v22  ;;  %v3592_v45 = vld [vmem:[%s8827_s3 + $0x2b8] sm:$0xff]  ;;  %v7725_v62 = vpack.c.bf16 %v3560_v10, %v3559_v39  ;;  %v3563_v22 = vld [vmem:[%s8827_s3 + $0x1d0] sm:$0xff]  ;;  %v7762_v26 = vpack.c.bf16 %v3580_v18, %v3579_v31  ;;  %v3581_v19 = vld [vmem:[%s8827_s3 + $0x260] sm:$0xff] }
 0x1a5   :  { %v866_v40 = vmax.f32 %v862_v46, 0.0  ;;  %v3577_v46 = vld [vmem:[%s8827_s3 + $0x240] sm:$0xff]  ;;  %v3564_v48 = vld [vmem:[%s8827_s3 + $0x1d8] sm:$0xff]  ;;  %v3595_v24 = vld [vmem:[%s8827_s3 + $0x2d0] sm:$0xff] }
 0x1a6   :  { %871 = vst [vmem:[#allocation2 + $0x18] sm:$0xff] %v867_v61  ;;  %v3578_v61 = vld [vmem:[%s8827_s3 + $0x248] sm:$0xff]  ;;  %v3596_v37 = vld [vmem:[%s8827_s3 + $0x2d8] sm:$0xff]  ;;  %v7781_v0 = vpack.c.bf16 %v3564_v48, %v3563_v22  ;;  %v3565_v10 = vld [vmem:[%s8827_s3 + $0x1e0] sm:$0xff] }
 0x1a7   :  { %870 = vst [vmem:[#allocation2 + $0x10] sm:$0xff] %v866_v40  ;;  %v7727_v40 = vpack.c.bf16 %v3592_v45, %v3591_v5  ;;  %v7734_v53 = vpack.c.bf16 %v3578_v61, %v3577_v46  ;;  %v3582_v8 = vld [vmem:[%s8827_s3 + $0x268] sm:$0xff]  ;;  %v7783_v39 = vpack.c.bf16 %v3596_v37, %v3595_v24  ;;  %v3597_v46 = vld [vmem:[%s8827_s3 + $0x2e0] sm:$0xff]  ;;  %v3583_v27 = vld [vmem:[%s8827_s3 + $0x270] sm:$0xff] }
 0x1a8   :  { %v7790_v5 = vpack.c.bf16 %v3582_v8, %v3581_v19  ;;  %v3566_v45 = vld [vmem:[%s8827_s3 + $0x1e8] sm:$0xff]  ;;  %v3584_v51 = vld [vmem:[%s8827_s3 + $0x278] sm:$0xff]  ;;  %v3567_v31 = vld [vmem:[%s8827_s3 + $0x1f0] sm:$0xff] }
 0x1a9   :  { %v7644_v49 = vld [vmem:[#allocation2 + $0x8] sm:$0x3f]  ;;  %v7809_v52 = vpack.c.bf16 %v3566_v45, %v3565_v10  ;;  %v7818_v18 = vpack.c.bf16 %v3584_v51, %v3583_v27  ;;  %v3568_v22 = vld [vmem:[%s8827_s3 + $0x1f8] sm:$0xff]  ;;  %v3599_v48 = vld [vmem:[%s8827_s3 + $0x2f0] sm:$0xff] }
 0x1aa   :  { %987 = vmatprep.mubr.f32.mxu0 %v7644_v49  ;;  %v7655_v6 = vld [vmem:[#allocation2] sm:$0x3f]  ;;  %v3598_v61 = vld [vmem:[%s8827_s3 + $0x2e8] sm:$0xff]  ;;  %v3600_v24 = vld [vmem:[%s8827_s3 + $0x2f8] sm:$0xff]  ;;  %v7831_v37 = vpack.c.bf16 %v3568_v22, %v3567_v31 }
 0x1ab   :  { %v7657_v4 = vld [vmem:[#allocation2 + $0x1] sm:$0x3f]  ;;  %988 = vmatmul.mubr.f32.vlgmr.msra.gmra.mrb[16].mxu0 %v7655_v6  ;;  %v7811_v7 = vpack.c.bf16 %v3598_v61, %v3597_v46  ;;  %v7833_v19 = vpack.c.bf16 %v3600_v24, %v3599_v48  ;;  %v3603_v45 = vld [vmem:[%s8829_s5 + $0x88] sm:$0xff]  ;;  %v3604_v61 = vld [vmem:[%s8829_s5 + $0x90] sm:$0xff] }
 0x1ac   :  { %4909 = vmatmul.mubr.f32.vlgmr.msra.gmra.mrb[32].mxu1 %v7657_v4  ;;  %5961 = vmatpush3.bf16.msra.mxu0 %v7631_v16  ;;  %v3602_v10 = vld [vmem:[%s8829_s5 + $0x80] sm:$0xff]  ;;  %v3605_v27 = vld [vmem:[%s8829_s5 + $0x98] sm:$0xff]  ;;  %v3607_v22 = vld [vmem:[%s8829_s5 + $0xa8] sm:$0xff] }
 0x1ad   :  { %5992 = vmatpush3.bf16.msra.mxu1 %v7633_v29  ;;  %1176 = vmatprep.mubr.f32.mxu0 %v7644_v49  ;;  %v7971_v46 = vpack.c.bf16 %v3603_v45, %v3602_v10  ;;  %v7983_v51 = vpack.c.bf16 %v3605_v27, %v3604_v61  ;;  %v3606_v31 = vld [vmem:[%s8829_s5 + $0xa0] sm:$0xff]  ;;  %v3608_v24 = vld [vmem:[%s8829_s5 + $0xb0] sm:$0xff]  ;;  %v3611_v61 = vld [vmem:[%s8829_s5 + $0xc8] sm:$0xff] }
 0x1ae   :  { %5963 = vmatprep.subr.bf16.mxu0 %v7646_v34  ;;  %5993 = vmatprep.subr.bf16.mxu1 %v6734_v55  ;;  %v7957_v8 = vld [vmem:[#allocation2 + $0x11] sm:$0x3f]  ;;  %v7995_v48 = vpack.c.bf16 %v3607_v22, %v3606_v31  ;;  %v3610_v45 = vld [vmem:[%s8829_s5 + $0xc0] sm:$0xff]  ;;  %v3613_v22 = vld [vmem:[%s8829_s5 + $0xd8] sm:$0xff] }
 0x1af   :  { %4943 = vmatprep.mubr.msk.f32.mxu1 %vm6735_vm0, %v8836_v63  ;;  %v8019_v27 = vpack.c.bf16 %v3611_v61, %v3610_v45  ;;  %v3612_v31 = vld [vmem:[%s8829_s5 + $0xd0] sm:$0xff]  ;;  %v3615_v45 = vld [vmem:[%s8829_s5 + $0xe8] sm:$0xff] }
 0x1b0   :  { %5965 = vmatpush3.bf16.msra.mxu0 %v7666_v21 }
 0x1b1   :  { %5995 = vmatpush3.bf16.msra.mxu1 %v7668_v13  ;;  %5967 = vmatprep.subr.bf16.mxu0 %v7675_v20 }
 0x1b2   :  { %5996 = vmatprep.subr.bf16.mxu1 %v6734_v55 }
 0x1b4   :  { %5969 = vmatpush3.bf16.msra.mxu0 %v7697_v14 }
 0x1b5   :  { %5998 = vmatpush3.bf16.msra.mxu1 %v7699_v9  ;;  %5971 = vmatprep.subr.bf16.mxu0 %v7706_v58 }
 0x1b6   :  { %5999 = vmatprep.subr.bf16.mxu1 %v6734_v55 }
 0x1b8   :  { %5973 = vmatpush3.bf16.msra.mxu0 %v7725_v62 }
 0x1b9   :  { %6001 = vmatpush3.bf16.msra.mxu1 %v7727_v40  ;;  %5975 = vmatprep.subr.bf16.mxu0 %v7734_v53 }
 0x1ba   :  { %6002 = vmatprep.subr.bf16.mxu1 %v6734_v55 }
 0x1bc   :  { %5977 = vmatpush3.bf16.msra.mxu0 %v7753_v17 }
 0x1bd   :  { %6004 = vmatpush3.bf16.msra.mxu1 %v7755_v56  ;;  %5979 = vmatprep.subr.bf16.mxu0 %v7762_v26 }
 0x1be   :  { %6005 = vmatprep.subr.bf16.mxu1 %v6734_v55 }
 0x1c0   :  { %5981 = vmatpush3.bf16.msra.mxu0 %v7781_v0 }
 0x1c1   :  { %6007 = vmatpush3.bf16.msra.mxu1 %v7783_v39  ;;  %5983 = vmatprep.subr.bf16.mxu0 %v7790_v5 }
 0x1c2   :  { %6008 = vmatprep.subr.bf16.mxu1 %v6734_v55 }
 0x1c4   :  { %5985 = vmatpush3.bf16.msra.mxu0 %v7809_v52 }
 0x1c5   :  { %6010 = vmatpush3.bf16.msra.mxu1 %v7811_v7  ;;  %5987 = vmatprep.subr.bf16.mxu0 %v7818_v18 }
 0x1c6   :  { %6011 = vmatprep.subr.bf16.mxu1 %v6734_v55 }
 0x1c8   :  { %5989 = vmatpush3.bf16.msra.mxu0 %v7831_v37 }
 0x1c9   :  { %6013 = vmatpush3.bf16.msra.mxu1 %v7833_v19  ;;  %6015 = vmatprep.subr.bf16.mxu0 %v7347_v54 }
 0x1ca   :  { %6046 = vmatprep.subr.bf16.mxu1 %v6734_v55 }
 0x1cb   :  { %1177 = vmatmul.mubr.f32.vlgmr.msra.gmra.mrb[18].mxu0 %v7655_v6  ;;  %v1252_v6 = vld [vmem:[#allocation2 + $0x9] sm:$0x3f] }
 0x1cc   :  { %4944 = vmatmul.mubr.f32.vlgmr.msra.gmra.mrb[34].mxu1 %v7657_v4  ;;  %6017 = vmatpush3.bf16.msra.mxu0 %v7359_v1 }
 0x1cd   :  { %1317 = vmatprep.mubr.f32.mxu0 %v7657_v4  ;;  %6048 = vmatpush3.bf16.msra.mxu1 %v7361_v2 }
 0x1ce   :  { %6019 = vmatprep.subr.bf16.mxu0 %v7373_v15  ;;  %6049 = vmatprep.subr.bf16.mxu1 %v6734_v55 }
 0x1cf   :  { %4978 = vmatprep.mubr.msk.f32.mxu1 %vm6735_vm0, %v8836_v63 }
 0x1d0   :  { %6021 = vmatpush3.bf16.msra.mxu0 %v7388_v23 }
 0x1d1   :  { %6051 = vmatpush3.bf16.msra.mxu1 %v7390_v3  ;;  %6023 = vmatprep.subr.bf16.mxu0 %v7403_v35 }
 0x1d2   :  { %6052 = vmatprep.subr.bf16.mxu1 %v6734_v55 }
 0x1d4   :  { %6025 = vmatpush3.bf16.msra.mxu0 %v7424_v36 }
 0x1d5   :  { %6054 = vmatpush3.bf16.msra.mxu1 %v7426_v57  ;;  %6027 = vmatprep.subr.bf16.mxu0 %v7430_v60 }
 0x1d6   :  { %6055 = vmatprep.subr.bf16.mxu1 %v6734_v55 }
 0x1d8   :  { %6029 = vmatpush3.bf16.msra.mxu0 %v7449_v32 }
 0x1d9   :  { %6057 = vmatpush3.bf16.msra.mxu1 %v7454_v43  ;;  %6031 = vmatprep.subr.bf16.mxu0 %v7467_v44 }
 0x1da   :  { %6058 = vmatprep.subr.bf16.mxu1 %v6734_v55 }
 0x1dc   :  { %6033 = vmatpush3.bf16.msra.mxu0 %v7482_v50 }
 0x1dd   :  { %6060 = vmatpush3.bf16.msra.mxu1 %v7488_v59  ;;  %6035 = vmatprep.subr.bf16.mxu0 %v7502_v11 }
 0x1de   :  { %6061 = vmatprep.subr.bf16.mxu1 %v6734_v55 }
 0x1e0   :  { %6037 = vmatpush3.bf16.msra.mxu0 %v7514_v28 }
 0x1e1   :  { %6063 = vmatpush3.bf16.msra.mxu1 %v7523_v25  ;;  %6039 = vmatprep.subr.bf16.mxu0 %v7535_v12 }
 0x1e2   :  { %6064 = vmatprep.subr.bf16.mxu1 %v6734_v55 }
 0x1e4   :  { %6041 = vmatpush3.bf16.msra.mxu0 %v7547_v33 }
 0x1e5   :  { %6066 = vmatpush3.bf16.msra.mxu1 %v7553_v38  ;;  %6043 = vmatprep.subr.bf16.mxu0 %v7565_v42 }
 0x1e6   :  { %6067 = vmatprep.subr.bf16.mxu1 %v6734_v55 }
 0x1e8   :  { %6045 = vmatpush3.bf16.msra.mxu0 %v7577_v30 }
 0x1e9   :  { %6069 = vmatpush3.bf16.msra.mxu1 %v7583_v47  ;;  %6071 = vmatprep.subr.bf16.mxu0 %v7593_v41 }
 0x1ea   :  { %6102 = vmatprep.subr.bf16.mxu1 %v6734_v55 }
 0x1eb   :  { %1318 = vmatmul.mubr.f32.vlgmr.msra.gmra.mrb[20].mxu0 %v7644_v49 }
 0x1ec   :  { %4979 = vmatmul.mubr.f32.vlgmr.msra.gmra.mrb[36].mxu1 %v1252_v6  ;;  %6073 = vmatpush3.bf16.msra.mxu0 %v7631_v16 }
 0x1ed   :  { %1457 = vmatprep.mubr.f32.mxu0 %v7657_v4  ;;  %6104 = vmatpush3.bf16.msra.mxu1 %v7633_v29  ;;  %v7915_v4 = vld [vmem:[#allocation2 + $0x18] sm:$0x3f] }
 0x1ee   :  { %6075 = vmatprep.subr.bf16.mxu0 %v7646_v34  ;;  %6105 = vmatprep.subr.bf16.mxu1 %v6734_v55 }
 0x1ef   :  { %5013 = vmatprep.mubr.msk.f32.mxu1 %vm6735_vm0, %v8836_v63 }
 0x1f0   :  { %6077 = vmatpush3.bf16.msra.mxu0 %v7666_v21 }
 0x1f1   :  { %6107 = vmatpush3.bf16.msra.mxu1 %v7668_v13  ;;  %6079 = vmatprep.subr.bf16.mxu0 %v7675_v20 }
 0x1f2   :  { %6108 = vmatprep.subr.bf16.mxu1 %v6734_v55 }
 0x1f4   :  { %6081 = vmatpush3.bf16.msra.mxu0 %v7697_v14 }
 0x1f5   :  { %6110 = vmatpush3.bf16.msra.mxu1 %v7699_v9  ;;  %6083 = vmatprep.subr.bf16.mxu0 %v7706_v58 }
 0x1f6   :  { %6111 = vmatprep.subr.bf16.mxu1 %v6734_v55 }
 0x1f8   :  { %6085 = vmatpush3.bf16.msra.mxu0 %v7725_v62 }
 0x1f9   :  { %6113 = vmatpush3.bf16.msra.mxu1 %v7727_v40  ;;  %6087 = vmatprep.subr.bf16.mxu0 %v7734_v53 }
 0x1fa   :  { %6114 = vmatprep.subr.bf16.mxu1 %v6734_v55 }
 0x1fc   :  { %6089 = vmatpush3.bf16.msra.mxu0 %v7753_v17 }
 0x1fd   :  { %6116 = vmatpush3.bf16.msra.mxu1 %v7755_v56  ;;  %6091 = vmatprep.subr.bf16.mxu0 %v7762_v26 }
 0x1fe   :  { %6117 = vmatprep.subr.bf16.mxu1 %v6734_v55 }
 0x200   :  { %6093 = vmatpush3.bf16.msra.mxu0 %v7781_v0 }
 0x201   :  { %6119 = vmatpush3.bf16.msra.mxu1 %v7783_v39  ;;  %6095 = vmatprep.subr.bf16.mxu0 %v7790_v5 }
 0x202   :  { %6120 = vmatprep.subr.bf16.mxu1 %v6734_v55 }
 0x204   :  { %6097 = vmatpush3.bf16.msra.mxu0 %v7809_v52 }
 0x205   :  { %6122 = vmatpush3.bf16.msra.mxu1 %v7811_v7  ;;  %6099 = vmatprep.subr.bf16.mxu0 %v7818_v18 }
 0x206   :  { %6123 = vmatprep.subr.bf16.mxu1 %v6734_v55 }
 0x208   :  { %6101 = vmatpush3.bf16.msra.mxu0 %v7831_v37 }
 0x209   :  { %6125 = vmatpush3.bf16.msra.mxu1 %v7833_v19  ;;  %6126 = vmatprep.subr.bf16.mxu0 %v6734_v55 }
 0x20a   :  { %6271 = vmatprep.subr.bf16.mxu1 %v7347_v54 }
 0x20b   :  { %1458 = vmatmul.mubr.f32.vlgmr.msra.gmra.mrb[22].mxu0 %v7644_v49  ;;  %v7936_v49 = vld [vmem:[#allocation2 + $0x10] sm:$0x3f] }
 0x20c   :  { %5014 = vmatmul.mubr.f32.vlgmr.msra.gmra.mrb[38].mxu1 %v1252_v6  ;;  %5048 = vmatprep.mubr.msk.f32.mxu0 %vm6735_vm0, %v8836_v63  ;;  %v3609_v6 = vld [vmem:[%s8829_s5 + $0xb8] sm:$0xff] }
 0x20d   :  { %6273 = vmatpush3.bf16.msra.mxu1 %v7359_v1  ;;  %2192 = vmatprep.mubr.f32.mxu1 %v7915_v4  ;;  %v8007_v10 = vpack.c.bf16 %v3609_v6, %v3608_v24  ;;  %v8031_v24 = vpack.c.bf16 %v3613_v22, %v3612_v31  ;;  %v3614_v6 = vld [vmem:[%s8829_s5 + $0xe0] sm:$0xff]  ;;  %v3616_v31 = vld [vmem:[%s8829_s5 + $0xf0] sm:$0xff]  ;;  %v3617_v22 = vld [vmem:[%s8829_s5 + $0xf8] sm:$0xff] }
 0x20e   :  { %6275 = vmatprep.subr.bf16.mxu1 %v7373_v15  ;;  %6128 = vmatpush3.bf16.msra.mxu0 %v7971_v46  ;;  %v8043_v61 = vpack.c.bf16 %v3615_v45, %v3614_v6  ;;  %v8057_v6 = vpack.c.bf16 %v3617_v22, %v3616_v31 }
 0x20f   :  { %6129 = vmatprep.subr.bf16.mxu0 %v6734_v55 }
 0x210   :  { %8850 = vst [vmem:[#allocation7_spill] sm:$0xff] %v8057_v6 }
 0x211   :  { %6277 = vmatpush3.bf16.msra.mxu1 %v7388_v23 }
 0x212   :  { %6279 = vmatprep.subr.bf16.mxu1 %v7403_v35  ;;  %6131 = vmatpush3.bf16.msra.mxu0 %v7983_v51 }
 0x213   :  { %6132 = vmatprep.subr.bf16.mxu0 %v6734_v55 }
 0x215   :  { %6281 = vmatpush3.bf16.msra.mxu1 %v7424_v36 }
 0x216   :  { %6283 = vmatprep.subr.bf16.mxu1 %v7430_v60  ;;  %6134 = vmatpush3.bf16.msra.mxu0 %v7995_v48 }
 0x217   :  { %6135 = vmatprep.subr.bf16.mxu0 %v6734_v55 }
 0x219   :  { %6285 = vmatpush3.bf16.msra.mxu1 %v7449_v32 }
 0x21a   :  { %6287 = vmatprep.subr.bf16.mxu1 %v7467_v44  ;;  %6137 = vmatpush3.bf16.msra.mxu0 %v8007_v10 }
 0x21b   :  { %6138 = vmatprep.subr.bf16.mxu0 %v6734_v55 }
 0x21d   :  { %6289 = vmatpush3.bf16.msra.mxu1 %v7482_v50 }
 0x21e   :  { %6291 = vmatprep.subr.bf16.mxu1 %v7502_v11  ;;  %6140 = vmatpush3.bf16.msra.mxu0 %v8019_v27 }
 0x21f   :  { %6141 = vmatprep.subr.bf16.mxu0 %v6734_v55 }
 0x221   :  { %6293 = vmatpush3.bf16.msra.mxu1 %v7514_v28 }
 0x222   :  { %6295 = vmatprep.subr.bf16.mxu1 %v7535_v12  ;;  %6143 = vmatpush3.bf16.msra.mxu0 %v8031_v24 }
 0x223   :  { %6144 = vmatprep.subr.bf16.mxu0 %v6734_v55 }
 0x225   :  { %6297 = vmatpush3.bf16.msra.mxu1 %v7547_v33 }
 0x226   :  { %6299 = vmatprep.subr.bf16.mxu1 %v7565_v42  ;;  %6146 = vmatpush3.bf16.msra.mxu0 %v8043_v61 }
 0x227   :  { %6147 = vmatprep.subr.bf16.mxu0 %v6734_v55 }
 0x229   :  { %6301 = vmatpush3.bf16.msra.mxu1 %v7577_v30 }
 0x22a   :  { %6302 = vmatprep.subr.bf16.mxu1 %v6734_v55  ;;  %6149 = vmatpush3.bf16.msra.mxu0 %v8057_v6 }
 0x22b   :  { %6150 = vmatprep.subr.bf16.mxu0 %v6734_v55 }
 0x22c   :  { %2193 = vmatmul.mubr.f32.vlgmr.msra.gmra.mrb[40].mxu1 %v7936_v49 }
 0x22d   :  { %6304 = vmatpush3.bf16.msra.mxu1 %v7361_v2  ;;  %5258 = vmatprep.mubr.msk.f32.mxu1 %vm6735_vm0, %v8836_v63 }
 0x22e   :  { %6305 = vmatprep.subr.bf16.mxu1 %v6734_v55 }
 0x231   :  { %6307 = vmatpush3.bf16.msra.mxu1 %v7390_v3 }
 0x232   :  { %6308 = vmatprep.subr.bf16.mxu1 %v6734_v55 }
 0x235   :  { %6310 = vmatpush3.bf16.msra.mxu1 %v7426_v57 }
 0x236   :  { %6311 = vmatprep.subr.bf16.mxu1 %v6734_v55 }
 0x239   :  { %6313 = vmatpush3.bf16.msra.mxu1 %v7454_v43 }
 0x23a   :  { %6314 = vmatprep.subr.bf16.mxu1 %v6734_v55 }
 0x23d   :  { %6316 = vmatpush3.bf16.msra.mxu1 %v7488_v59 }
 0x23e   :  { %6317 = vmatprep.subr.bf16.mxu1 %v6734_v55 }
 0x241   :  { %6319 = vmatpush3.bf16.msra.mxu1 %v7523_v25 }
 0x242   :  { %6320 = vmatprep.subr.bf16.mxu1 %v6734_v55 }
 0x245   :  { %6322 = vmatpush3.bf16.msra.mxu1 %v7553_v38 }
 0x246   :  { %6323 = vmatprep.subr.bf16.mxu1 %v6734_v55 }
 0x249   :  { %6325 = vmatpush3.bf16.msra.mxu1 %v7583_v47 }
 0x24a   :  { %6327 = vmatprep.subr.bf16.mxu1 %v7593_v41 }
 0x24c   :  { %5259 = vmatmul.mubr.f32.vlgmr.msra.gmra.mrb[42].mxu1 %v7957_v8 }
 0x24d   :  { %6329 = vmatpush3.bf16.msra.mxu1 %v7631_v16  ;;  %2380 = vmatprep.mubr.f32.mxu1 %v7915_v4 }
 0x24e   :  { %6331 = vmatprep.subr.bf16.mxu1 %v7646_v34 }
 0x251   :  { %6333 = vmatpush3.bf16.msra.mxu1 %v7666_v21 }
 0x252   :  { %6335 = vmatprep.subr.bf16.mxu1 %v7675_v20 }
 0x255   :  { %6337 = vmatpush3.bf16.msra.mxu1 %v7697_v14 }
 0x256   :  { %6339 = vmatprep.subr.bf16.mxu1 %v7706_v58 }
 0x259   :  { %6341 = vmatpush3.bf16.msra.mxu1 %v7725_v62 }
 0x25a   :  { %6343 = vmatprep.subr.bf16.mxu1 %v7734_v53 }
 0x25d   :  { %6345 = vmatpush3.bf16.msra.mxu1 %v7753_v17 }
 0x25e   :  { %6347 = vmatprep.subr.bf16.mxu1 %v7762_v26 }
 0x261   :  { %6349 = vmatpush3.bf16.msra.mxu1 %v7781_v0 }
 0x262   :  { %6351 = vmatprep.subr.bf16.mxu1 %v7790_v5 }
 0x265   :  { %6353 = vmatpush3.bf16.msra.mxu1 %v7809_v52 }
 0x266   :  { %6355 = vmatprep.subr.bf16.mxu1 %v7818_v18 }
 0x269   :  { %6357 = vmatpush3.bf16.msra.mxu1 %v7831_v37 }
 0x26a   :  { %6358 = vmatprep.subr.bf16.mxu1 %v6734_v55 }
 0x26c   :  { %2381 = vmatmul.mubr.f32.vlgmr.msra.gmra.mrb[44].mxu1 %v7936_v49 }
 0x26d   :  { %6360 = vmatpush3.bf16.msra.mxu1 %v7633_v29  ;;  %5293 = vmatprep.mubr.msk.f32.mxu1 %vm6735_vm0, %v8836_v63 }
 0x26e   :  { %6361 = vmatprep.subr.bf16.mxu1 %v6734_v55 }
 0x271   :  { %6363 = vmatpush3.bf16.msra.mxu1 %v7668_v13 }
 0x272   :  { %6364 = vmatprep.subr.bf16.mxu1 %v6734_v55 }
 0x275   :  { %6366 = vmatpush3.bf16.msra.mxu1 %v7699_v9 }
 0x276   :  { %6367 = vmatprep.subr.bf16.mxu1 %v6734_v55 }
 0x279   :  { %6369 = vmatpush3.bf16.msra.mxu1 %v7727_v40 }
 0x27a   :  { %6370 = vmatprep.subr.bf16.mxu1 %v6734_v55 }
 0x27d   :  { %6372 = vmatpush3.bf16.msra.mxu1 %v7755_v56 }
 0x27e   :  { %v4102_v49 = vpop.f32.mrb[16].mxu0  ;;  %6373 = vmatprep.subr.bf16.mxu1 %v6734_v55 }
 0x27f   :  { %v1059_v45 = vpop.f32.mrb[32].mxu1  ;;  %v4103_v31 = vpop.f32.mrb[17].mxu0 }
 0x280   :  { %v4910_v22 = vpop.f32.mrb[33].mxu1  ;;  %v4104_v63 = vadd.f32 %v4103_v31, %v4102_v49  ;;  %v1553_v31 = vld [vmem:[%s8829_s5 + $0x30] sm:$0xff] }
 0x281   :  { %6375 = vmatpush3.bf16.msra.mxu1 %v7783_v39  ;;  %v1554_v22 = vld [vmem:[%s8829_s5 + $0x38] sm:$0xff] }
 0x282   :  { %v8071_v6 = vadd.f32 %v4104_v63, %v1059_v45  ;;  %6376 = vmatprep.subr.bf16.mxu1 %v6734_v55 }
 0x285   :  { %6378 = vmatpush3.bf16.msra.mxu1 %v7811_v7 }
 0x286   :  { %6379 = vmatprep.subr.bf16.mxu1 %v6734_v55 }
 0x289   :  { %6381 = vmatpush3.bf16.msra.mxu1 %v7833_v19 }
 0x28a   :  { %6383 = vmatprep.subr.bf16.mxu1 %v7347_v54 }
 0x28c   :  { %5294 = vmatmul.mubr.f32.vlgmr.msra.gmra.mrb[46].mxu1 %v7957_v8 }
 0x28d   :  { %6385 = vmatpush3.bf16.msra.mxu1 %v7359_v1  ;;  %2521 = vmatprep.mubr.f32.mxu1 %v7957_v8 }
 0x28e   :  { %6387 = vmatprep.subr.bf16.mxu1 %v7373_v15 }
 0x291   :  { %6389 = vmatpush3.bf16.msra.mxu1 %v7388_v23 }
 0x292   :  { %6391 = vmatprep.subr.bf16.mxu1 %v7403_v35 }
 0x295   :  { %6393 = vmatpush3.bf16.msra.mxu1 %v7424_v36  ;;  %v8851_v36 = vmov 0.0  }
 0x296   :  { %6395 = vmatprep.subr.bf16.mxu1 %v7430_v60 }
 0x299   :  { %6397 = vmatpush3.bf16.msra.mxu1 %v7449_v32 }
 0x29a   :  { %6399 = vmatprep.subr.bf16.mxu1 %v7467_v44 }
 0x29d   :  { %6401 = vmatpush3.bf16.msra.mxu1 %v7482_v50 }
 0x29e   :  { %v4154_v54 = vpop.f32.mrb[18].mxu0  ;;  %6403 = vmatprep.subr.bf16.mxu1 %v7502_v11 }
 0x29f   :  { %v1248_v1 = vpop.f32.mrb[34].mxu1  ;;  %v4155_v63 = vpop.f32.mrb[19].mxu0 }
 0x2a0   :  { %v4945_v15 = vpop.f32.mrb[35].mxu1  ;;  %v4156_v49 = vadd.f32 %v4155_v63, %v4154_v54  ;;  %v8179_v54 = vpack.c.bf16 %v1554_v22, %v1553_v31  ;;  %v1556_v63 = vld [vmem:[%s8829_s5 + $0x48] sm:$0xff] }
 0x2a1   :  { %6405 = vmatpush3.bf16.msra.mxu1 %v7514_v28 }
 0x2a2   :  { %v1249_v23 = vadd.f32 %v4156_v49, %v1248_v1  ;;  %6407 = vmatprep.subr.bf16.mxu1 %v7535_v12  ;;  %v1555_v1 = vld [vmem:[%s8829_s5 + $0x40] sm:$0xff] }
 0x2a4   :  { %v1533_v35 = vmax.f32 %v8071_v6, %v1249_v23  ;;  %v1552_v6 = vld [vmem:[%s8829_s5 + $0x28] sm:$0xff] }
 0x2a5   :  { %6409 = vmatpush3.bf16.msra.mxu1 %v7547_v33 }
 0x2a6   :  { %6411 = vmatprep.subr.bf16.mxu1 %v7565_v42 }
 0x2a9   :  { %6413 = vmatpush3.bf16.msra.mxu1 %v7577_v30 }
 0x2aa   :  { %6414 = vmatprep.subr.bf16.mxu1 %v6734_v55 }
 0x2ac   :  { %2522 = vmatmul.mubr.f32.vlgmr.msra.gmra.mrb[48].mxu1 %v7915_v4 }
 0x2ad   :  { %6416 = vmatpush3.bf16.msra.mxu1 %v7361_v2  ;;  %5328 = vmatprep.mubr.msk.f32.mxu1 %vm6735_vm0, %v8851_v36 }
 0x2ae   :  { %6417 = vmatprep.subr.bf16.mxu1 %v6734_v55 }
 0x2b1   :  { %6419 = vmatpush3.bf16.msra.mxu1 %v7390_v3 }
 0x2b2   :  { %6420 = vmatprep.subr.bf16.mxu1 %v6734_v55 }
 0x2b5   :  { %6422 = vmatpush3.bf16.msra.mxu1 %v7426_v57  ;;  %v2456_v57 = vld [vmem:[#allocation2 + $0x19] sm:$0x3f] }
 0x2b6   :  { %6423 = vmatprep.subr.bf16.mxu1 %v6734_v55 }
 0x2b9   :  { %6425 = vmatpush3.bf16.msra.mxu1 %v7454_v43 }
 0x2ba   :  { %6426 = vmatprep.subr.bf16.mxu1 %v6734_v55 }
 0x2bd   :  { %6428 = vmatpush3.bf16.msra.mxu1 %v7488_v59 }
 0x2be   :  { %v4206_v2 = vpop.f32.mrb[20].mxu0  ;;  %6429 = vmatprep.subr.bf16.mxu1 %v6734_v55 }
 0x2bf   :  { %v1389_v60 = vpop.f32.mrb[36].mxu1  ;;  %v4207_v32 = vpop.f32.mrb[21].mxu0 }
 0x2c0   :  { %v4208_v44 = vadd.f32 %v4207_v32, %v4206_v2  ;;  %v4980_v50 = vpop.f32.mrb[37].mxu1  ;;  %v1557_v2 = vld [vmem:[%s8829_s5 + $0x50] sm:$0xff] }
 0x2c1   :  { %6431 = vmatpush3.bf16.msra.mxu1 %v7523_v25  ;;  %v1560_v50 = vld [vmem:[%s8829_s5 + $0x68] sm:$0xff] }
 0x2c2   :  { %v1390_v3 = vadd.f32 %v4208_v44, %v1389_v60  ;;  %6432 = vmatprep.subr.bf16.mxu1 %v6734_v55  ;;  %v1558_v60 = vld [vmem:[%s8829_s5 + $0x58] sm:$0xff]  ;;  %v1559_v44 = vld [vmem:[%s8829_s5 + $0x60] sm:$0xff] }
 0x2c3   :  { %v8199_v32 = vpack.c.bf16 %v1558_v60, %v1557_v2  ;;  %v3631_v60 = vld [vmem:[%s8829_s5 + $0x168] sm:$0xff] }
 0x2c5   :  { %6434 = vmatpush3.bf16.msra.mxu1 %v7553_v38  ;;  %v8133_v38 = vld [vmem:[%s8828_s4] ss:$0 sm:$0xff] }
 0x2c6   :  { %6435 = vmatprep.subr.bf16.mxu1 %v6734_v55 }
 0x2c9   :  { %6437 = vmatpush3.bf16.msra.mxu1 %v7583_v47 }
 0x2ca   :  { %6470 = vmatprep.subr.bf16.mxu1 %v6734_v55 }
 0x2cc   :  { %5329 = vmatmul.mubr.f32.vlgmr.msra.gmra.mrb[50].mxu1 %v2456_v57 }
 0x2cd   :  { %6472 = vmatpush3.bf16.msra.mxu1 %v7633_v29  ;;  %5363 = vmatprep.mubr.msk.f32.mxu1 %vm6735_vm0, %v8851_v36  ;;  %v1547_v29 = vld [vmem:[%s8829_s5] sm:$0xff] }
 0x2ce   :  { %6473 = vmatprep.subr.bf16.mxu1 %v6734_v55 }
 0x2d1   :  { %6475 = vmatpush3.bf16.msra.mxu1 %v7668_v13  ;;  %v1548_v13 = vld [vmem:[%s8829_s5 + $0x8] sm:$0xff] }
 0x2d2   :  { %6476 = vmatprep.subr.bf16.mxu1 %v6734_v55 }
 0x2d5   :  { %6478 = vmatpush3.bf16.msra.mxu1 %v7699_v9  ;;  %v8148_v9 = vpack.c.bf16 %v1548_v13, %v1547_v29  ;;  %v3623_v29 = vld [vmem:[%s8829_s5 + $0x128] sm:$0xff] }
 0x2d6   :  { %6479 = vmatprep.subr.bf16.mxu1 %v6734_v55 }
 0x2d9   :  { %6481 = vmatpush3.bf16.msra.mxu1 %v7727_v40  ;;  %v1549_v40 = vld [vmem:[%s8829_s5 + $0x10] sm:$0xff] }
 0x2da   :  { %6482 = vmatprep.subr.bf16.mxu1 %v6734_v55 }
 0x2dd   :  { %6484 = vmatpush3.bf16.msra.mxu1 %v7755_v56  ;;  %v1550_v56 = vld [vmem:[%s8829_s5 + $0x18] sm:$0xff] }
 0x2de   :  { %v4258_v43 = vpop.f32.mrb[22].mxu0  ;;  %6485 = vmatprep.subr.bf16.mxu1 %v6734_v55 }
 0x2df   :  { %v1529_v59 = vpop.f32.mrb[38].mxu1  ;;  %v4259_v11 = vpop.f32.mrb[23].mxu0 }
 0x2e0   :  { %v4260_v28 = vadd.f32 %v4259_v11, %v4258_v43  ;;  %v5015_v25 = vpop.f32.mrb[39].mxu1  ;;  %v1562_v43 = vld [vmem:[%s8829_s5 + $0x78] sm:$0xff]  ;;  %v3618_v11 = vld [vmem:[%s8829_s5 + $0x100] sm:$0xff] }
 0x2e1   :  { %6487 = vmatpush3.bf16.msra.mxu1 %v7783_v39 }
 0x2e2   :  { %v1530_v12 = vadd.f32 %v4260_v28, %v1529_v59  ;;  %6488 = vmatprep.subr.bf16.mxu1 %v6734_v55  ;;  %v3619_v28 = vld [vmem:[%s8829_s5 + $0x108] sm:$0xff] }
 0x2e3   :  { %v8229_v25 = vpack.c.bf16 %v3619_v28, %v3618_v11  ;;  %v3634_v11 = vld [vmem:[%s8829_s5 + $0x180] sm:$0xff]  ;;  %v3635_v28 = vld [vmem:[%s8829_s5 + $0x188] sm:$0xff] }
 0x2e4   :  { %v1534_v33 = vmax.f32 %v1390_v3, %v1530_v12  ;;  %v8209_v3 = vpack.c.bf16 %v1560_v50, %v1559_v44  ;;  %v3620_v12 = vld [vmem:[%s8829_s5 + $0x110] sm:$0xff] }
 0x2e5   :  { %6490 = vmatpush3.bf16.msra.mxu1 %v7811_v7  ;;  %v8157_v7 = vpack.c.bf16 %v1550_v56, %v1549_v40  ;;  %v3624_v40 = vld [vmem:[%s8829_s5 + $0x130] sm:$0xff]  ;;  %v3625_v56 = vld [vmem:[%s8829_s5 + $0x138] sm:$0xff] }
 0x2e6   :  { %v1535_v42 = vmax.f32 %v1533_v35, %v1534_v33  ;;  %6491 = vmatprep.subr.bf16.mxu1 %v6734_v55  ;;  %v8189_v35 = vpack.c.bf16 %v1556_v63, %v1555_v1  ;;  %v3621_v33 = vld [vmem:[%s8829_s5 + $0x118] sm:$0xff]  ;;  %v3632_v50 = vld [vmem:[%s8829_s5 + $0x170] sm:$0xff] }
 0x2e8   :  { %v1543_v30 = vadd.f32 %v8133_v38, %v1535_v42 }
 0x2e9   :  { %6493 = vmatpush3.bf16.msra.mxu1 %v7833_v19  ;;  %v1551_v19 = vld [vmem:[%s8829_s5 + $0x20] sm:$0xff] }
 0x2ea   :  { %v1544_v47 = vmax.f32 %v1543_v30, 0.0  ;;  %6638 = vmatprep.subr.bf16.mxu1 %v6734_v55  ;;  %v8169_v45 = vpack.c.bf16 %v1552_v6, %v1551_v19  ;;  %v8239_v30 = vpack.c.bf16 %v3621_v33, %v3620_v12  ;;  %v3626_v19 = vld [vmem:[%s8829_s5 + $0x140] sm:$0xff]  ;;  %v3627_v6 = vld [vmem:[%s8829_s5 + $0x148] sm:$0xff]  ;;  %v8313_v12 = vpack.c.bf16 %v3635_v28, %v3634_v11  ;;  %v3636_v33 = vld [vmem:[%s8829_s5 + $0x190] sm:$0xff] }
 0x2eb   :  { %v8273_v63 = vpack.c.bf16 %v3627_v6, %v3626_v19  ;;  %v3640_v6 = vld [vmem:[%s8829_s5 + $0x1b0] sm:$0xff]  ;;  %v3645_v28 = vld [vmem:[%s8829_s5 + $0x1d8] sm:$0xff] }
 0x2ec   :  { %1545 = vst [vmem:[#allocation3] sm:$0x3f] %v1544_v47  ;;  %5364 = vmatmul.mubr.f32.vlgmr.msra.gmra.mrb[52].mxu1 %v2456_v57  ;;  %v1561_v57 = vld [vmem:[%s8829_s5 + $0x70] sm:$0xff]  ;;  %v3622_v47 = vld [vmem:[%s8829_s5 + $0x120] sm:$0xff] }
 0x2ed   :  { %5608 = vmatprep.mubr.msk.f32.mxu1 %vm6735_vm0, %v8851_v36  ;;  %v8219_v59 = vpack.c.bf16 %v1562_v43, %v1561_v57  ;;  %v8251_v13 = vpack.c.bf16 %v3623_v29, %v3622_v47  ;;  %v3633_v57 = vld [vmem:[%s8829_s5 + $0x178] sm:$0xff]  ;;  %v3644_v11 = vld [vmem:[%s8829_s5 + $0x1d0] sm:$0xff] }
 0x2ee   :  { %v8303_v43 = vpack.c.bf16 %v3633_v57, %v3632_v50 }
 0x2f3   :  { %v1563_v39 = vld [vmem:[#allocation3 + $0x1] sm:$0x1]  ;;  %v1546_v42 = vld [vmem:[#allocation3] sm:$0x1]  ;;  %v1721_v47 = vld [vmem:[#allocation3 + $0x2] sm:$0x1] }
 0x2f4   :  { %5049 = vmatmul.mubr.f32.vlgmr.msra.gmra.mrb[24].mxu0 %v1563_v39  ;;  %v8261_v39 = vpack.c.bf16 %v3625_v56, %v3624_v40  ;;  %v3638_v40 = vld [vmem:[%s8829_s5 + $0x1a0] sm:$0xff]  ;;  %v3639_v56 = vld [vmem:[%s8829_s5 + $0x1a8] sm:$0xff] }
 0x2f5   :  { %6152 = vmatpush3.bf16.msra.mxu0 %v8148_v9  ;;  %5083 = vmatprep.mubr.msk.f32.mxu0 %vm6735_vm0, %v8851_v36  ;;  %v8335_v19 = vpack.c.bf16 %v3639_v56, %v3638_v40  ;;  %v3648_v56 = vld [vmem:[%s8829_s5 + $0x1f0] sm:$0xff] }
 0x2f6   :  { %6153 = vmatprep.subr.bf16.mxu0 %v6734_v55 }
 0x2f9   :  { %6155 = vmatpush3.bf16.msra.mxu0 %v8157_v7 }
 0x2fa   :  { %6156 = vmatprep.subr.bf16.mxu0 %v6734_v55 }
 0x2fd   :  { %6158 = vmatpush3.bf16.msra.mxu0 %v8169_v45 }
 0x2fe   :  { %6159 = vmatprep.subr.bf16.mxu0 %v6734_v55 }
 0x2ff   :  { %v4412_v15 = vpop.f32.mrb[40].mxu1 }
 0x300   :  { %v4413_v49 = vpop.f32.mrb[41].mxu1 }
 0x301   :  { %v4414_v23 = vadd.f32 %v4413_v49, %v4412_v15  ;;  %6161 = vmatpush3.bf16.msra.mxu0 %v8179_v54  ;;  %v3628_v15 = vld [vmem:[%s8829_s5 + $0x150] sm:$0xff]  ;;  %v3629_v49 = vld [vmem:[%s8829_s5 + $0x158] sm:$0xff] }
 0x302   :  { %6162 = vmatprep.subr.bf16.mxu0 %v6734_v55  ;;  %v8283_v2 = vpack.c.bf16 %v3629_v49, %v3628_v15  ;;  %v3642_v15 = vld [vmem:[%s8829_s5 + $0x1c0] sm:$0xff]  ;;  %v3643_v49 = vld [vmem:[%s8829_s5 + $0x1c8] sm:$0xff] }
 0x303   :  { %v8355_v57 = vpack.c.bf16 %v3643_v49, %v3642_v15  ;;  %v3650_v15 = vld [vmem:[%s8829_s5 + $0x200] sm:$0xff]  ;;  %v3651_v49 = vld [vmem:[%s8829_s5 + $0x208] sm:$0xff] }
 0x305   :  { %6164 = vmatpush3.bf16.msra.mxu0 %v8189_v35 }
 0x306   :  { %6165 = vmatprep.subr.bf16.mxu0 %v6734_v55 }
 0x309   :  { %6167 = vmatpush3.bf16.msra.mxu0 %v8199_v32 }
 0x30a   :  { %6168 = vmatprep.subr.bf16.mxu0 %v6734_v55 }
 0x30d   :  { %6170 = vmatpush3.bf16.msra.mxu0 %v8209_v3 }
 0x30e   :  { %6171 = vmatprep.subr.bf16.mxu0 %v6734_v55 }
 0x311   :  { %6173 = vmatpush3.bf16.msra.mxu0 %v8219_v59 }
 0x312   :  { %6174 = vmatprep.subr.bf16.mxu0 %v6734_v55 }
 0x314   :  { %5084 = vmatmul.mubr.f32.vlgmr.msra.gmra.mrb[24].mxu0 %v1546_v42  ;;  %v3637_v42 = vld [vmem:[%s8829_s5 + $0x198] sm:$0xff] }
 0x315   :  { %6176 = vmatpush3.bf16.msra.mxu0 %v8229_v25  ;;  %5118 = vmatprep.mubr.msk.f32.mxu0 %vm6735_vm0, %v8851_v36  ;;  %v8323_v29 = vpack.c.bf16 %v3637_v42, %v3636_v33  ;;  %v8365_v33 = vpack.c.bf16 %v3645_v28, %v3644_v11  ;;  %v3646_v42 = vld [vmem:[%s8829_s5 + $0x1e0] sm:$0xff]  ;;  %v3653_v11 = vld [vmem:[%s8829_s5 + $0x218] sm:$0xff] }
 0x316   :  { %6177 = vmatprep.subr.bf16.mxu0 %v6734_v55  ;;  %v1810_v28 = vld [vmem:[#allocation3 + $0x3] sm:$0x1] }
 0x319   :  { %6179 = vmatpush3.bf16.msra.mxu0 %v8239_v30 }
 0x31a   :  { %6180 = vmatprep.subr.bf16.mxu0 %v6734_v55 }
 0x31d   :  { %6182 = vmatpush3.bf16.msra.mxu0 %v8251_v13 }
 0x31e   :  { %6183 = vmatprep.subr.bf16.mxu0 %v6734_v55 }
 0x31f   :  { %v2264_v31 = vpop.f32.mrb[42].mxu1 }
 0x320   :  { %v8270_v22 = vadd.f32 %v4414_v23, %v2264_v31  ;;  %v5260_v1 = vpop.f32.mrb[43].mxu1  ;;  %v3630_v23 = vld [vmem:[%s8829_s5 + $0x160] sm:$0xff]  ;;  %v3641_v31 = vld [vmem:[%s8829_s5 + $0x1b8] sm:$0xff] }
 0x321   :  { %6185 = vmatpush3.bf16.msra.mxu0 %v8261_v39  ;;  %v8293_v44 = vpack.c.bf16 %v3631_v60, %v3630_v23  ;;  %v8345_v1 = vpack.c.bf16 %v3641_v31, %v3640_v6  ;;  %v3649_v6 = vld [vmem:[%s8829_s5 + $0x1f8] sm:$0xff] }
 0x322   :  { %6186 = vmatprep.subr.bf16.mxu0 %v6734_v55  ;;  %v8385_v31 = vpack.c.bf16 %v3649_v6, %v3648_v56  ;;  %v3655_v56 = vld [vmem:[%s8829_s5 + $0x228] sm:$0xff] }
 0x325   :  { %6188 = vmatpush3.bf16.msra.mxu0 %v8273_v63 }
 0x326   :  { %6189 = vmatprep.subr.bf16.mxu0 %v6734_v55 }
 0x329   :  { %6191 = vmatpush3.bf16.msra.mxu0 %v8283_v2 }
 0x32a   :  { %6192 = vmatprep.subr.bf16.mxu0 %v6734_v55 }
 0x32d   :  { %6194 = vmatpush3.bf16.msra.mxu0 %v8293_v44 }
 0x32e   :  { %6195 = vmatprep.subr.bf16.mxu0 %v6734_v55 }
 0x331   :  { %6197 = vmatpush3.bf16.msra.mxu0 %v8303_v43 }
 0x332   :  { %6198 = vmatprep.subr.bf16.mxu0 %v6734_v55 }
 0x334   :  { %5119 = vmatmul.mubr.f32.vlgmr.msra.gmra.mrb[24].mxu0 %v1721_v47  ;;  %v3647_v47 = vld [vmem:[%s8829_s5 + $0x1e8] sm:$0xff] }
 0x335   :  { %6200 = vmatpush3.bf16.msra.mxu0 %v8313_v12  ;;  %5153 = vmatprep.mubr.msk.f32.mxu0 %vm6735_vm0, %v8851_v36  ;;  %v8375_v40 = vpack.c.bf16 %v3647_v47, %v3646_v42  ;;  %v3654_v47 = vld [vmem:[%s8829_s5 + $0x220] sm:$0xff] }
 0x336   :  { %6201 = vmatprep.subr.bf16.mxu0 %v6734_v55  ;;  %v8417_v6 = vpack.c.bf16 %v3655_v56, %v3654_v47 }
 0x338   :  { %8854 = vst [vmem:[#allocation10_spill] sm:$0xff] %v8417_v6 }
 0x339   :  { %6203 = vmatpush3.bf16.msra.mxu0 %v8323_v29 }
 0x33a   :  { %6204 = vmatprep.subr.bf16.mxu0 %v6734_v55 }
 0x33d   :  { %6206 = vmatpush3.bf16.msra.mxu0 %v8335_v19 }
 0x33e   :  { %6207 = vmatprep.subr.bf16.mxu0 %v6734_v55 }
 0x33f   :  { %v4464_v23 = vpop.f32.mrb[44].mxu1 }
 0x340   :  { %v4465_v60 = vpop.f32.mrb[45].mxu1 }
 0x341   :  { %v4466_v50 = vadd.f32 %v4465_v60, %v4464_v23  ;;  %6209 = vmatpush3.bf16.msra.mxu0 %v8345_v1  ;;  %v8395_v23 = vpack.c.bf16 %v3651_v49, %v3650_v15  ;;  %v3652_v60 = vld [vmem:[%s8829_s5 + $0x210] sm:$0xff]  ;;  %v3657_v49 = vld [vmem:[%s8829_s5 + $0x238] sm:$0xff] }
 0x342   :  { %6210 = vmatprep.subr.bf16.mxu0 %v6734_v55  ;;  %v8405_v42 = vpack.c.bf16 %v3653_v11, %v3652_v60  ;;  %v3656_v15 = vld [vmem:[%s8829_s5 + $0x230] sm:$0xff]  ;;  %v3658_v11 = vld [vmem:[%s8829_s5 + $0x240] sm:$0xff] }
 0x343   :  { %8852 = vst [vmem:[#allocation8_spill] sm:$0xff] %v8395_v23  ;;  %v8427_v60 = vpack.c.bf16 %v3657_v49, %v3656_v15  ;;  %v3660_v49 = vld [vmem:[%s8829_s5 + $0x250] sm:$0xff] }
 0x344   :  { %8853 = vst [vmem:[#allocation9_spill] sm:$0xff] %v8405_v42 }
 0x345   :  { %6212 = vmatpush3.bf16.msra.mxu0 %v8355_v57  ;;  %8855 = vst [vmem:[#allocation11_spill] sm:$0xff] %v8427_v60 }
 0x346   :  { %6213 = vmatprep.subr.bf16.mxu0 %v6734_v55 }
 0x349   :  { %6215 = vmatpush3.bf16.msra.mxu0 %v8365_v33 }
 0x34a   :  { %6216 = vmatprep.subr.bf16.mxu0 %v6734_v55 }
 0x34d   :  { %6218 = vmatpush3.bf16.msra.mxu0 %v8375_v40 }
 0x34e   :  { %6219 = vmatprep.subr.bf16.mxu0 %v6734_v55 }
 0x351   :  { %6221 = vmatpush3.bf16.msra.mxu0 %v8385_v31 }
 0x352   :  { %6222 = vmatprep.subr.bf16.mxu0 %v6734_v55 }
 0x354   :  { %5154 = vmatmul.mubr.f32.vlgmr.msra.gmra.mrb[24].mxu0 %v1810_v28  ;;  %v3659_v28 = vld [vmem:[%s8829_s5 + $0x248] sm:$0xff] }
 0x355   :  { %6224 = vmatpush3.bf16.msra.mxu0 %v8395_v23  ;;  %5188 = vmatprep.mubr.msk.f32.mxu0 %vm6735_vm0, %v8851_v36  ;;  %v8439_v23 = vpack.c.bf16 %v3659_v28, %v3658_v11  ;;  %v3663_v11 = vld [vmem:[%s8829_s5 + $0x268] sm:$0xff] }
 0x356   :  { %6225 = vmatprep.subr.bf16.mxu0 %v6734_v55 }
 0x357   :  { %8856 = vst [vmem:[#allocation12_spill] sm:$0xff] %v8439_v23 }
 0x359   :  { %6227 = vmatpush3.bf16.msra.mxu0 %v8405_v42 }
 0x35a   :  { %6228 = vmatprep.subr.bf16.mxu0 %v6734_v55 }
 0x35d   :  { %6230 = vmatpush3.bf16.msra.mxu0 %v8417_v6  ;;  %v3661_v6 = vld [vmem:[%s8829_s5 + $0x258] sm:$0xff] }
 0x35e   :  { %6231 = vmatprep.subr.bf16.mxu0 %v6734_v55 }
 0x35f   :  { %v2452_v47 = vpop.f32.mrb[46].mxu1 }
 0x360   :  { %v8436_v56 = vadd.f32 %v4466_v50, %v2452_v47  ;;  %v5295_v42 = vpop.f32.mrb[47].mxu1  ;;  %v8451_v50 = vpack.c.bf16 %v3661_v6, %v3660_v49  ;;  %v3664_v6 = vld [vmem:[%s8829_s5 + $0x270] sm:$0xff]  ;;  %v3665_v47 = vld [vmem:[%s8829_s5 + $0x278] sm:$0xff] }
 0x361   :  { %6233 = vmatpush3.bf16.msra.mxu0 %v8427_v60  ;;  %v3662_v42 = vld [vmem:[%s8829_s5 + $0x260] sm:$0xff]  ;;  %v8471_v49 = vpack.c.bf16 %v3665_v47, %v3664_v6  ;;  %v3668_v6 = vld [vmem:[%s8829_s5 + $0x290] sm:$0xff]  ;;  %v3669_v47 = vld [vmem:[%s8829_s5 + $0x298] sm:$0xff] }
 0x362   :  { %6234 = vmatprep.subr.bf16.mxu0 %v6734_v55  ;;  %8857 = vst [vmem:[#allocation13_spill] sm:$0xff] %v8451_v50  ;;  %v8461_v28 = vpack.c.bf16 %v3663_v11, %v3662_v42  ;;  %v3666_v42 = vld [vmem:[%s8829_s5 + $0x280] sm:$0xff]  ;;  %v3667_v11 = vld [vmem:[%s8829_s5 + $0x288] sm:$0xff] }
 0x363   :  { %8859 = vst [vmem:[#allocation15_spill] sm:$0xff] %v8471_v49  ;;  %v8481_v15 = vpack.c.bf16 %v3667_v11, %v3666_v42  ;;  %v3670_v42 = vld [vmem:[%s8829_s5 + $0x2a0] sm:$0xff]  ;;  %v3671_v11 = vld [vmem:[%s8829_s5 + $0x2a8] sm:$0xff] }
 0x364   :  { %8858 = vst [vmem:[#allocation14_spill] sm:$0xff] %v8461_v28 }
 0x365   :  { %6236 = vmatpush3.bf16.msra.mxu0 %v8439_v23  ;;  %8860 = vst [vmem:[#allocation16_spill] sm:$0xff] %v8481_v15 }
 0x366   :  { %6237 = vmatprep.subr.bf16.mxu0 %v6734_v55 }
 0x369   :  { %6239 = vmatpush3.bf16.msra.mxu0 %v8451_v50  ;;  %v8491_v50 = vpack.c.bf16 %v3669_v47, %v3668_v6  ;;  %v3672_v6 = vld [vmem:[%s8829_s5 + $0x2b0] sm:$0xff]  ;;  %v3673_v47 = vld [vmem:[%s8829_s5 + $0x2b8] sm:$0xff] }
 0x36a   :  { %6240 = vmatprep.subr.bf16.mxu0 %v6734_v55 }
 0x36b   :  { %8861 = vst [vmem:[#allocation17_spill] sm:$0xff] %v8491_v50 }
 0x36d   :  { %6242 = vmatpush3.bf16.msra.mxu0 %v8461_v28  ;;  %v1899_v28 = vld [vmem:[#allocation3 + $0x4] sm:$0x1] }
 0x36e   :  { %6243 = vmatprep.subr.bf16.mxu0 %v6734_v55 }
 0x371   :  { %6245 = vmatpush3.bf16.msra.mxu0 %v8471_v49 }
 0x372   :  { %6246 = vmatprep.subr.bf16.mxu0 %v6734_v55 }
 0x374   :  { %5189 = vmatmul.mubr.f32.vlgmr.msra.gmra.mrb[24].mxu0 %v1899_v28  ;;  %v8503_v28 = vpack.c.bf16 %v3671_v11, %v3670_v42  ;;  %v3674_v42 = vld [vmem:[%s8829_s5 + $0x2c0] sm:$0xff]  ;;  %v3675_v11 = vld [vmem:[%s8829_s5 + $0x2c8] sm:$0xff] }
 0x375   :  { %6248 = vmatpush3.bf16.msra.mxu0 %v8481_v15  ;;  %5223 = vmatprep.mubr.msk.f32.mxu0 %vm6735_vm0, %v8851_v36  ;;  %v8513_v15 = vpack.c.bf16 %v3673_v47, %v3672_v6  ;;  %v8523_v60 = vpack.c.bf16 %v3675_v11, %v3674_v42  ;;  %v3676_v6 = vld [vmem:[%s8829_s5 + $0x2d0] sm:$0xff]  ;;  %v3677_v47 = vld [vmem:[%s8829_s5 + $0x2d8] sm:$0xff] }
 0x376   :  { %6249 = vmatprep.subr.bf16.mxu0 %v6734_v55  ;;  %8862 = vst [vmem:[#allocation18_spill] sm:$0xff] %v8503_v28  ;;  %v3680_v11 = vld [vmem:[%s8829_s5 + $0x2f0] sm:$0xff] }
 0x379   :  { %6251 = vmatpush3.bf16.msra.mxu0 %v8491_v50 }
 0x37a   :  { %6252 = vmatprep.subr.bf16.mxu0 %v6734_v55 }
 0x37d   :  { %6254 = vmatpush3.bf16.msra.mxu0 %v8503_v28  ;;  %v8533_v28 = vpack.c.bf16 %v3677_v47, %v3676_v6  ;;  %v3681_v6 = vld [vmem:[%s8829_s5 + $0x2f8] sm:$0xff] }
 0x37e   :  { %6255 = vmatprep.subr.bf16.mxu0 %v6734_v55  ;;  %v8553_v47 = vpack.c.bf16 %v3681_v6, %v3680_v11 }
 0x37f   :  { %v4516_v50 = vpop.f32.mrb[48].mxu1 }
 0x380   :  { %v4517_v49 = vpop.f32.mrb[49].mxu1 }
 0x381   :  { %v4518_v23 = vadd.f32 %v4517_v49, %v4516_v50  ;;  %6257 = vmatpush3.bf16.msra.mxu0 %v8513_v15  ;;  %v3678_v50 = vld [vmem:[%s8829_s5 + $0x2e0] sm:$0xff]  ;;  %v3679_v49 = vld [vmem:[%s8829_s5 + $0x2e8] sm:$0xff] }
 0x382   :  { %6258 = vmatprep.subr.bf16.mxu0 %v6734_v55  ;;  %v8543_v42 = vpack.c.bf16 %v3679_v49, %v3678_v50  ;;  %v1988_v50 = vld [vmem:[#allocation3 + $0x5] sm:$0x1] }
 0x385   :  { %6260 = vmatpush3.bf16.msra.mxu0 %v8523_v60 }
 0x386   :  { %6261 = vmatprep.subr.bf16.mxu0 %v6734_v55 }
 0x389   :  { %6263 = vmatpush3.bf16.msra.mxu0 %v8533_v28 }
 0x38a   :  { %6264 = vmatprep.subr.bf16.mxu0 %v6734_v55 }
 0x38d   :  { %6266 = vmatpush3.bf16.msra.mxu0 %v8543_v42 }
 0x38e   :  { %6267 = vmatprep.subr.bf16.mxu0 %v6734_v55 }
 0x391   :  { %6269 = vmatpush3.bf16.msra.mxu0 %v8553_v47 }
 0x392   :  { %6439 = vmatprep.subr.bf16.mxu0 %v7593_v41 }
 0x394   :  { %5224 = vmatmul.mubr.f32.vlgmr.msra.gmra.mrb[24].mxu0 %v1988_v50 }
 0x395   :  { %6441 = vmatpush3.bf16.msra.mxu0 %v7631_v16  ;;  %2661 = vmatprep.mubr.f32.mxu0 %v7957_v8  ;;  %v3291_v8 = vld [vmem:[%s8831_s7 + $0x8] sm:$0xff] }
 0x396   :  { %6443 = vmatprep.subr.bf16.mxu0 %v7646_v34  ;;  %v8863_v34 = vld [vmem:[#allocation7_spill] sm:$0xff] }
 0x399   :  { %6445 = vmatpush3.bf16.msra.mxu0 %v7666_v21 }
 0x39a   :  { %6447 = vmatprep.subr.bf16.mxu0 %v7675_v20 }
 0x39d   :  { %6449 = vmatpush3.bf16.msra.mxu0 %v7697_v14 }
 0x39e   :  { %6451 = vmatprep.subr.bf16.mxu0 %v7706_v58 }
 0x39f   :  { %v2593_v49 = vpop.f32.mrb[50].mxu1 }
 0x3a0   :  { %v2594_v11 = vadd.f32 %v4518_v23, %v2593_v49  ;;  %v5330_v6 = vpop.f32.mrb[51].mxu1  ;;  %v3384_v49 = vld [vmem:[%s8833_s9] sm:$0xff] }
 0x3a1   :  { %6453 = vmatpush3.bf16.msra.mxu0 %v7725_v62 }
 0x3a2   :  { %6455 = vmatprep.subr.bf16.mxu0 %v7734_v53 }
 0x3a5   :  { %6457 = vmatpush3.bf16.msra.mxu0 %v7753_v17 }
 0x3a6   :  { %6459 = vmatprep.subr.bf16.mxu0 %v7762_v26  ;;  %v8864_v26 = vmax.f32 %v8270_v22, %v8436_v56  ;;  %v8867_v22 = vld [vmem:[#allocation10_spill] sm:$0xff]  ;;  %v3305_v56 = vld [vmem:[%s8831_s7 + $0x78] sm:$0xff] }
 0x3a9   :  { %6461 = vmatpush3.bf16.msra.mxu0 %v7781_v0 }
 0x3aa   :  { %6463 = vmatprep.subr.bf16.mxu0 %v7790_v5 }
 0x3ad   :  { %6465 = vmatpush3.bf16.msra.mxu0 %v7809_v52 }
 0x3ae   :  { %6467 = vmatprep.subr.bf16.mxu0 %v7818_v18 }
 0x3b1   :  { %6469 = vmatpush3.bf16.msra.mxu0 %v7831_v37 }
 0x3b2   :  { %6494 = vmatprep.subr.bf16.mxu0 %v6734_v55 }
 0x3b4   :  { %2662 = vmatmul.mubr.f32.vlgmr.msra.gmra.mrb[26].mxu0 %v7915_v4  ;;  %v3290_v4 = vld [vmem:[%s8831_s7] sm:$0xff] }
 0x3b5   :  { %6496 = vmatpush3.bf16.msra.mxu0 %v7971_v46  ;;  %5398 = vmatprep.mubr.msk.f32.mxu0 %vm6735_vm0, %v8851_v36  ;;  %v3292_v46 = vld [vmem:[%s8831_s7 + $0x10] sm:$0xff] }
 0x3b6   :  { %6497 = vmatprep.subr.bf16.mxu0 %v6734_v55 }
 0x3b9   :  { %6499 = vmatpush3.bf16.msra.mxu0 %v7983_v51  ;;  %v6639_v51 = vpack.c.bf16 %v3291_v8, %v3290_v4  ;;  %v3396_v8 = vld [vmem:[%s8833_s9 + $0x60] sm:$0xff] }
 0x3ba   :  { %6500 = vmatprep.subr.bf16.mxu0 %v6734_v55 }
 0x3bb   :  { %6640 = vmatpush3.bf16.msra.mxu1 %v6639_v51 }
 0x3bc   :  { %6641 = vmatprep.subr.bf16.mxu1 %v6734_v55 }
 0x3bd   :  { %6502 = vmatpush3.bf16.msra.mxu0 %v7995_v48  ;;  %v3293_v48 = vld [vmem:[%s8831_s7 + $0x18] sm:$0xff] }
 0x3be   :  { %6503 = vmatprep.subr.bf16.mxu0 %v6734_v55 }
 0x3bf   :  { %v2733_v41 = vpop.f32.mrb[52].mxu1 }
 0x3c0   :  { %v5365_v16 = vpop.f32.mrb[53].mxu1 }
 0x3c1   :  { %6505 = vmatpush3.bf16.msra.mxu0 %v8007_v10  ;;  %v6642_v10 = vpack.c.bf16 %v3293_v48, %v3292_v46  ;;  %v3397_v46 = vld [vmem:[%s8833_s9 + $0x68] sm:$0xff]  ;;  %v3398_v48 = vld [vmem:[%s8833_s9 + $0x70] sm:$0xff] }
 0x3c2   :  { %6506 = vmatprep.subr.bf16.mxu0 %v6734_v55  ;;  %v6681_v51 = vpack.c.bf16 %v3397_v46, %v3396_v8 }
 0x3c3   :  { %6643 = vmatpush3.bf16.msra.mxu1 %v6642_v10  ;;  %v3399_v10 = vld [vmem:[%s8833_s9 + $0x78] sm:$0xff] }
 0x3c4   :  { %6644 = vmatprep.subr.bf16.mxu1 %v6734_v55 }
 0x3c5   :  { %6508 = vmatpush3.bf16.msra.mxu0 %v8019_v27  ;;  %v3294_v27 = vld [vmem:[%s8831_s7 + $0x20] sm:$0xff] }
 0x3c6   :  { %6509 = vmatprep.subr.bf16.mxu0 %v6734_v55 }
 0x3c9   :  { %6511 = vmatpush3.bf16.msra.mxu0 %v8031_v24  ;;  %v3295_v24 = vld [vmem:[%s8831_s7 + $0x28] sm:$0xff] }
 0x3ca   :  { %6512 = vmatprep.subr.bf16.mxu0 %v6734_v55 }
 0x3cd   :  { %6514 = vmatpush3.bf16.msra.mxu0 %v8043_v61  ;;  %v6645_v61 = vpack.c.bf16 %v3295_v24, %v3294_v27  ;;  %v6684_v27 = vpack.c.bf16 %v3399_v10, %v3398_v48  ;;  %v3812_v24 = vld [vmem:[%s8832_s8] ss:$0 sm:$0xff] }
 0x3ce   :  { %6515 = vmatprep.subr.bf16.mxu0 %v6734_v55 }
 0x3cf   :  { %6646 = vmatpush3.bf16.msra.mxu1 %v6645_v61 }
 0x3d0   :  { %6647 = vmatprep.subr.bf16.mxu1 %v6734_v55 }
 0x3d1   :  { %6517 = vmatpush3.bf16.msra.mxu0 %v8863_v34 }
 0x3d2   :  { %6518 = vmatprep.subr.bf16.mxu0 %v6734_v55 }
 0x467   :  { %v8594_v21 = vpop.f32.mrb[24].mxu0 }
 0x468   :  { %v5225_v20 = vpop.f32.mrb[25].mxu0 }
 0x469   :  { %v3386_v20 = vld [vmem:[%s8833_s9 + $0x10] sm:$0xff] }
 0x487   :  { %v4568_v14 = vpop.f32.mrb[26].mxu0 }
 0x488   :  { %v4569_v58 = vpop.f32.mrb[27].mxu0 }
 0x489   :  { %v4570_v62 = vadd.f32 %v4569_v58, %v4568_v14  ;;  %v3387_v14 = vld [vmem:[%s8833_s9 + $0x18] sm:$0xff] }
 0x48a   :  { %v6666_v58 = vpack.c.bf16 %v3387_v14, %v3386_v20 }
 0x48b   :  { %v2734_v53 = vadd.f32 %v4570_v62, %v2733_v41  ;;  %v3389_v62 = vld [vmem:[%s8833_s9 + $0x28] sm:$0xff] }
 0x48d   :  { %v2738_v17 = vmax.f32 %v2594_v11, %v2734_v53  ;;  %v3385_v11 = vld [vmem:[%s8833_s9 + $0x8] sm:$0xff] }
 0x48e   :  { %v6663_v16 = vpack.c.bf16 %v3385_v11, %v3384_v49 }
 0x48f   :  { %v2739_v0 = vmax.f32 %v8864_v26, %v2738_v17  ;;  %v3390_v17 = vld [vmem:[%s8833_s9 + $0x30] sm:$0xff] }
 0x491   :  { %v2747_v5 = vadd.f32 %v8133_v38, %v2739_v0  ;;  %v3296_v38 = vld [vmem:[%s8831_s7 + $0x30] sm:$0xff]  ;;  %v3392_v0 = vld [vmem:[%s8833_s9 + $0x40] sm:$0xff] }
 0x493   :  { %v2748_v52 = vmax.f32 %v2747_v5, 0.0  ;;  %v3393_v5 = vld [vmem:[%s8833_s9 + $0x48] sm:$0xff] }
 0x495   :  { %2749 = vst [vmem:[#allocation3] sm:$0x3f] %v2748_v52  ;;  %v6675_v52 = vpack.c.bf16 %v3393_v5, %v3392_v0 }
 0x49c   :  { %v2767_v18 = vld [vmem:[#allocation3 + $0x1] sm:$0x1]  ;;  %v2750_v37 = vld [vmem:[#allocation3] sm:$0x1] }
 0x49d   :  { %5399 = vmatmul.mubr.f32.vlgmr.msra.gmra.mrb[28].mxu0 %v2767_v18  ;;  %v3394_v18 = vld [vmem:[%s8833_s9 + $0x50] sm:$0xff] }
 0x49e   :  { %6520 = vmatpush3.bf16.msra.mxu0 %v8148_v9  ;;  %5433 = vmatprep.mubr.msk.f32.mxu0 %vm6735_vm0, %v8851_v36  ;;  %v3297_v9 = vld [vmem:[%s8831_s7 + $0x38] sm:$0xff] }
 0x49f   :  { %6521 = vmatprep.subr.bf16.mxu0 %v6734_v55 }
 0x4a2   :  { %6523 = vmatpush3.bf16.msra.mxu0 %v8157_v7  ;;  %v6648_v7 = vpack.c.bf16 %v3297_v9, %v3296_v38 }
 0x4a3   :  { %6524 = vmatprep.subr.bf16.mxu0 %v6734_v55 }
 0x4a4   :  { %6649 = vmatpush3.bf16.msra.mxu1 %v6648_v7 }
 0x4a5   :  { %6650 = vmatprep.subr.bf16.mxu1 %v6734_v55 }
 0x4a6   :  { %6526 = vmatpush3.bf16.msra.mxu0 %v8169_v45  ;;  %v3298_v45 = vld [vmem:[%s8831_s7 + $0x40] sm:$0xff] }
 0x4a7   :  { %6527 = vmatprep.subr.bf16.mxu0 %v6734_v55 }
 0x4aa   :  { %6529 = vmatpush3.bf16.msra.mxu0 %v8179_v54  ;;  %v3299_v54 = vld [vmem:[%s8831_s7 + $0x48] sm:$0xff] }
 0x4ab   :  { %6530 = vmatprep.subr.bf16.mxu0 %v6734_v55 }
 0x4ae   :  { %6532 = vmatpush3.bf16.msra.mxu0 %v8189_v35  ;;  %v6651_v35 = vpack.c.bf16 %v3299_v54, %v3298_v45 }
 0x4af   :  { %6533 = vmatprep.subr.bf16.mxu0 %v6734_v55 }
 0x4b0   :  { %6652 = vmatpush3.bf16.msra.mxu1 %v6651_v35 }
 0x4b1   :  { %6653 = vmatprep.subr.bf16.mxu1 %v6734_v55 }
 0x4b2   :  { %6535 = vmatpush3.bf16.msra.mxu0 %v8199_v32  ;;  %v3300_v32 = vld [vmem:[%s8831_s7 + $0x50] sm:$0xff] }
 0x4b3   :  { %6536 = vmatprep.subr.bf16.mxu0 %v6734_v55 }
 0x4b6   :  { %6538 = vmatpush3.bf16.msra.mxu0 %v8209_v3  ;;  %v3301_v3 = vld [vmem:[%s8831_s7 + $0x58] sm:$0xff] }
 0x4b7   :  { %6539 = vmatprep.subr.bf16.mxu0 %v6734_v55 }
 0x4ba   :  { %6541 = vmatpush3.bf16.msra.mxu0 %v8219_v59  ;;  %v6654_v59 = vpack.c.bf16 %v3301_v3, %v3300_v32 }
 0x4bb   :  { %6542 = vmatprep.subr.bf16.mxu0 %v6734_v55 }
 0x4bc   :  { %6655 = vmatpush3.bf16.msra.mxu1 %v6654_v59 }
 0x4bd   :  { %5434 = vmatmul.mubr.f32.vlgmr.msra.gmra.mrb[28].mxu0 %v2750_v37  ;;  %6656 = vmatprep.subr.bf16.mxu1 %v6734_v55  ;;  %v3395_v37 = vld [vmem:[%s8833_s9 + $0x58] sm:$0xff] }
 0x4be   :  { %6544 = vmatpush3.bf16.msra.mxu0 %v8229_v25  ;;  %5468 = vmatprep.mubr.msk.f32.mxu0 %vm6735_vm0, %v8851_v36  ;;  %v2924_v25 = vld [vmem:[#allocation3 + $0x2] sm:$0x1]  ;;  %v6678_v4 = vpack.c.bf16 %v3395_v37, %v3394_v18 }
 0x4bf   :  { %6545 = vmatprep.subr.bf16.mxu0 %v6734_v55 }
 0x4c2   :  { %6547 = vmatpush3.bf16.msra.mxu0 %v8239_v30  ;;  %v3012_v30 = vld [vmem:[#allocation3 + $0x3] sm:$0x1] }
 0x4c3   :  { %6548 = vmatprep.subr.bf16.mxu0 %v6734_v55 }
 0x4c6   :  { %6550 = vmatpush3.bf16.msra.mxu0 %v8251_v13  ;;  %v8865_v13 = vld [vmem:[#allocation8_spill] sm:$0xff] }
 0x4c7   :  { %6551 = vmatprep.subr.bf16.mxu0 %v6734_v55 }
 0x4ca   :  { %6553 = vmatpush3.bf16.msra.mxu0 %v8261_v39  ;;  %v8866_v39 = vld [vmem:[#allocation9_spill] sm:$0xff] }
 0x4cb   :  { %6554 = vmatprep.subr.bf16.mxu0 %v6734_v55 }
 0x4ce   :  { %6556 = vmatpush3.bf16.msra.mxu0 %v8273_v63  ;;  %v8868_v63 = vld [vmem:[#allocation11_spill] sm:$0xff] }
 0x4cf   :  { %6557 = vmatprep.subr.bf16.mxu0 %v6734_v55 }
 0x4d2   :  { %6559 = vmatpush3.bf16.msra.mxu0 %v8283_v2  ;;  %v8869_v2 = vld [vmem:[#allocation12_spill] sm:$0xff] }
 0x4d3   :  { %6560 = vmatprep.subr.bf16.mxu0 %v6734_v55 }
 0x4d6   :  { %6562 = vmatpush3.bf16.msra.mxu0 %v8293_v44  ;;  %v8870_v44 = vld [vmem:[#allocation13_spill] sm:$0xff] }
 0x4d7   :  { %6563 = vmatprep.subr.bf16.mxu0 %v6734_v55 }
 0x4da   :  { %6565 = vmatpush3.bf16.msra.mxu0 %v8303_v43  ;;  %v8871_v43 = vld [vmem:[#allocation14_spill] sm:$0xff] }
 0x4db   :  { %6566 = vmatprep.subr.bf16.mxu0 %v6734_v55 }
 0x4dd   :  { %5469 = vmatmul.mubr.f32.vlgmr.msra.gmra.mrb[28].mxu0 %v2924_v25 }
 0x4de   :  { %6568 = vmatpush3.bf16.msra.mxu0 %v8313_v12  ;;  %5503 = vmatprep.mubr.msk.f32.mxu0 %vm6735_vm0, %v8851_v36  ;;  %v8872_v12 = vld [vmem:[#allocation15_spill] sm:$0xff] }
 0x4df   :  { %6569 = vmatprep.subr.bf16.mxu0 %v6734_v55 }
 0x4e2   :  { %6571 = vmatpush3.bf16.msra.mxu0 %v8323_v29  ;;  %v3100_v29 = vld [vmem:[#allocation3 + $0x4] sm:$0x1] }
 0x4e3   :  { %6572 = vmatprep.subr.bf16.mxu0 %v6734_v55 }
 0x4e6   :  { %6574 = vmatpush3.bf16.msra.mxu0 %v8335_v19  ;;  %v8873_v19 = vld [vmem:[#allocation16_spill] sm:$0xff] }
 0x4e7   :  { %6575 = vmatprep.subr.bf16.mxu0 %v6734_v55 }
 0x4ea   :  { %6577 = vmatpush3.bf16.msra.mxu0 %v8345_v1  ;;  %v8874_v1 = vld [vmem:[#allocation17_spill] sm:$0xff] }
 0x4eb   :  { %6578 = vmatprep.subr.bf16.mxu0 %v6734_v55 }
 0x4ee   :  { %6580 = vmatpush3.bf16.msra.mxu0 %v8355_v57  ;;  %v8875_v57 = vld [vmem:[#allocation18_spill] sm:$0xff] }
 0x4ef   :  { %6581 = vmatprep.subr.bf16.mxu0 %v6734_v55 }
 0x4f2   :  { %6583 = vmatpush3.bf16.msra.mxu0 %v8365_v33  ;;  %v3188_v33 = vld [vmem:[#allocation3 + $0x5] sm:$0x1] }
 0x4f3   :  { %6584 = vmatprep.subr.bf16.mxu0 %v6734_v55 }
 0x4f6   :  { %6586 = vmatpush3.bf16.msra.mxu0 %v8375_v40  ;;  %v3302_v40 = vld [vmem:[%s8831_s7 + $0x60] sm:$0xff] }
 0x4f7   :  { %6587 = vmatprep.subr.bf16.mxu0 %v6734_v55 }
 0x4fa   :  { %6589 = vmatpush3.bf16.msra.mxu0 %v8385_v31  ;;  %v3303_v31 = vld [vmem:[%s8831_s7 + $0x68] sm:$0xff] }
 0x4fb   :  { %6590 = vmatprep.subr.bf16.mxu0 %v6734_v55  ;;  %v6657_v23 = vpack.c.bf16 %v3303_v31, %v3302_v40 }
 0x4fd   :  { %5504 = vmatmul.mubr.f32.vlgmr.msra.gmra.mrb[28].mxu0 %v3012_v30  ;;  %6658 = vmatpush3.bf16.msra.mxu1 %v6657_v23 }
 0x4fe   :  { %6592 = vmatpush3.bf16.msra.mxu0 %v8865_v13  ;;  %5538 = vmatprep.mubr.msk.f32.mxu0 %vm6735_vm0, %v8851_v36 }
 0x4ff   :  { %6593 = vmatprep.subr.bf16.mxu0 %v6734_v55  ;;  %6659 = vmatprep.subr.bf16.mxu1 %v6734_v55 }
 0x502   :  { %6595 = vmatpush3.bf16.msra.mxu0 %v8866_v39 }
 0x503   :  { %6596 = vmatprep.subr.bf16.mxu0 %v6734_v55 }
 0x506   :  { %6598 = vmatpush3.bf16.msra.mxu0 %v8867_v22 }
 0x507   :  { %6599 = vmatprep.subr.bf16.mxu0 %v6734_v55 }
 0x50a   :  { %6601 = vmatpush3.bf16.msra.mxu0 %v8868_v63 }
 0x50b   :  { %6602 = vmatprep.subr.bf16.mxu0 %v6734_v55 }
 0x50e   :  { %6604 = vmatpush3.bf16.msra.mxu0 %v8869_v2 }
 0x50f   :  { %6605 = vmatprep.subr.bf16.mxu0 %v6734_v55 }
 0x512   :  { %6607 = vmatpush3.bf16.msra.mxu0 %v8870_v44 }
 0x513   :  { %6608 = vmatprep.subr.bf16.mxu0 %v6734_v55 }
 0x516   :  { %6610 = vmatpush3.bf16.msra.mxu0 %v8871_v43 }
 0x517   :  { %6611 = vmatprep.subr.bf16.mxu0 %v6734_v55 }
 0x51a   :  { %6613 = vmatpush3.bf16.msra.mxu0 %v8872_v12 }
 0x51b   :  { %6614 = vmatprep.subr.bf16.mxu0 %v6734_v55 }
 0x51d   :  { %5539 = vmatmul.mubr.f32.vlgmr.msra.gmra.mrb[28].mxu0 %v3100_v29 }
 0x51e   :  { %6616 = vmatpush3.bf16.msra.mxu0 %v8873_v19  ;;  %5573 = vmatprep.mubr.msk.f32.mxu0 %vm6735_vm0, %v8851_v36 }
 0x51f   :  { %6617 = vmatprep.subr.bf16.mxu0 %v6734_v55 }
 0x522   :  { %6619 = vmatpush3.bf16.msra.mxu0 %v8874_v1 }
 0x523   :  { %6620 = vmatprep.subr.bf16.mxu0 %v6734_v55 }
 0x526   :  { %6622 = vmatpush3.bf16.msra.mxu0 %v8875_v57 }
 0x527   :  { %6623 = vmatprep.subr.bf16.mxu0 %v6734_v55 }
 0x52a   :  { %6625 = vmatpush3.bf16.msra.mxu0 %v8513_v15 }
 0x52b   :  { %6626 = vmatprep.subr.bf16.mxu0 %v6734_v55 }
 0x52e   :  { %6628 = vmatpush3.bf16.msra.mxu0 %v8523_v60  ;;  %v3304_v60 = vld [vmem:[%s8831_s7 + $0x70] sm:$0xff] }
 0x52f   :  { %6629 = vmatprep.subr.bf16.mxu0 %v6734_v55  ;;  %v6660_v15 = vpack.c.bf16 %v3305_v56, %v3304_v60 }
 0x531   :  { %6661 = vmatpush3.bf16.msra.mxu1 %v6660_v15 }
 0x532   :  { %6631 = vmatpush3.bf16.msra.mxu0 %v8533_v28  ;;  %6662 = vmatprep.subr.bf16.mxu1 %v6734_v55 }
 0x533   :  { %6632 = vmatprep.subr.bf16.mxu0 %v6734_v55 }
 0x536   :  { %6634 = vmatpush3.bf16.msra.mxu0 %v8543_v42 }
 0x537   :  { %6635 = vmatprep.subr.bf16.mxu0 %v6734_v55 }
 0x53a   :  { %6637 = vmatpush3.bf16.msra.mxu0 %v8553_v47  ;;  %v3811_v47 = vld [vmem:[%s8830_s6] ss:$0 sm:$0xff] }
 0x53d   :  { %5574 = vmatmul.mubr.f32.vlgmr.msra.gmra.mrb[28].mxu0 %v3188_v33 }
 0x610   :  { %v3271_v28 = vpop.f32.mrb[28].mxu0 }
 0x611   :  { %v3277_v42 = vrot.slane %v3271_v28, 7  ;;  %v5575_v50 = vpop.f32.mrb[29].mxu0 }
 0x613   :  { %v3280_v6 = vsel %vm3279_vm1, %v8594_v21, %v3277_v42  ;;  %v3388_v21 = vld [vmem:[%s8833_s9 + $0x20] sm:$0xff] }
 0x614   :  { %v3288_v41 = vadd.f32 %v3811_v47, %v3280_v6  ;;  %v6669_v53 = vpack.c.bf16 %v3389_v62, %v3388_v21 }
 0x616   :  { %v3289_v34 = vmax.f32 %v3288_v41, 0.0 }
 0x618   :  { %5609 = vmatmul.mubr.f32.vlgmr.msra.gmra.mrb[54].mxu1 %v3289_v34 }
 0x619   :  { %6664 = vmatpush3.bf16.msra.mxu1 %v6663_v16  ;;  %5643 = vmatprep.mubr.msk.f32.mxu1 %vm6735_vm0, %v8851_v36  ;;  %v3391_v36 = vld [vmem:[%s8833_s9 + $0x38] sm:$0xff]  ;;  %s6710_s9 = scalar_lea.vmem %s3485_s24, 32 }
 0x61a   :  { %6665 = vmatprep.subr.bf16.mxu1 %v6734_v55  ;;  %v6672_v26 = vpack.c.bf16 %v3391_v36, %v3390_v17  ;;  %p6711_p0 = scmp.ne.s32.totalorder %s3485_s24, %s6710_s9  ;;  %p6716_p2 = scmp.lt.s32.totalorder %s6710_s9, %s6710_s9 }
 0x61c   :  { %p6717_p3 = por %p6716_p2, %p6715_p1 }
 0x61d   :  { %6667 = vmatpush3.bf16.msra.mxu1 %v6666_v58 }
 0x61e   :  { %6668 = vmatprep.subr.bf16.mxu1 %v6734_v55  ;;  %p6718_p4 = pnand %p6717_p3, %p6711_p0 }
 0x621   :  { %6670 = vmatpush3.bf16.msra.mxu1 %v6669_v53 }
 0x622   :  { %6671 = vmatprep.subr.bf16.mxu1 %v6734_v55 }
 0x625   :  { %6673 = vmatpush3.bf16.msra.mxu1 %v6672_v26 }
 0x626   :  { %6674 = vmatprep.subr.bf16.mxu1 %v6734_v55 }
 0x629   :  { %6676 = vmatpush3.bf16.msra.mxu1 %v6675_v52 }
 0x62a   :  { %6677 = vmatprep.subr.bf16.mxu1 %v6734_v55 }
 0x62d   :  { %6679 = vmatpush3.bf16.msra.mxu1 %v6678_v4 }
 0x62e   :  { %6680 = vmatprep.subr.bf16.mxu1 %v6734_v55 }
 0x631   :  { %6682 = vmatpush3.bf16.msra.mxu1 %v6681_v51 }
 0x632   :  { %6683 = vmatprep.subr.bf16.mxu1 %v6734_v55  ;;  %v3813_v55 = vld [vmem:[%s8834_s10] ss:$0 sm:$0xff] }
 0x635   :  { %6685 = vmatpush3.bf16.msra.mxu1 %v6684_v27 }
 0x6eb   :  { %v3379_v61 = vpop.f32.mrb[54].mxu1 }
 0x6ec   :  { %v3380_v38 = vadd.f32 %v3812_v24, %v3379_v61  ;;  %v5610_v9 = vpop.f32.mrb[55].mxu1 }
 0x6ee   :  { %v3383_v7 = vmax.f32 %v3380_v38, 0.0 }
 0x6f0   :  { %5644 = vmatmul.mubr.f32.vlgmr.msra.gmra.mrb[56].mxu1 %v3383_v7 }
 0x7c3   :  { %v3473_v45 = vpop.f32.mrb[56].mxu1 }
 0x7c4   :  { %v3474_v54 = vadd.f32 %v3813_v55, %v3473_v45  ;;  %v5645_v35 = vpop.f32.mrb[57].mxu1 }
 0x7c6   :  { %3477 = vst [vmem:[#allocation4] sm:$0x3] %v3474_v54 }
 0x7c7   :  { %6721 = shalt.err (!%p6718_p4)
}
 0x7c8   :  { %s6722_s25 = scalar_lea.hbm %s8835_s11, 32 }
 0x7c9   :  { %p6723_p5 = scmp.ne.s32.totalorder %s8835_s11, %s6722_s25  ;;  %p6726_p6 = scmp.lt.u32.totalorder %s6722_s25, %s8835_s11 }
 0x7cb   :  { %p6728_p7 = pnand %p6726_p6, %p6723_p5 }
 0x7cd   :  { %6731 = shalt.err (!%p6728_p7)
}
 0x7ce   :  { %3487 = dma.vmem_to_hbm [thread:$0]  %s3485_s24, 32, %s8835_s11, [#allocation5]  }
 0x7cf   :  { %6732 = dma.done.wait [#allocation5], 32  }
 0x7d0   :  { %6733 = vsyncadd [#allocation5], 4294967264 }
 0x7d1   :  { %3491 = vsyncpa [#allocation5], 1 }

</bundles_post_ra>
